<compile_context>
chip_gen: v6e
topology: v6e:2x2x1
jax: 0.10.0
libtpu: 0.0.40
codegen_flags: <defaults>
</compile_context>

<pallas_src>
import functools

import jax
import jax.numpy as jnp
from jax.experimental import pallas as pl
from jax.experimental.pallas import tpu as pltpu

BN_EPS = 1e-5


def bnneck_stats_kernel(x_ref, ones_ref, gamma_ref, beta_ref,
                        scale_ref, shift_ref, sum_ref, sq_ref, *, inv_count):
    """Accumulate per-channel sum / sum-of-squares over (batch, spatial) and, on
    the last batch step, emit the BatchNorm affine as per-channel (scale, shift).

    x_ref:                (TN, TC, L) current batch-block / channel-tile slab
    ones_ref:             (L, 1)      f32 ones (resident; MXU reduction RHS)
    gamma_ref, beta_ref:  (TC, 1)     f32 affine params (resident)
    scale_ref, shift_ref: (TC, 1)     f32 outputs (written on the last batch step)
    sum_ref, sq_ref:      (TC, 1)     f32 accumulators (persist across batch steps)
    """
    ni = pl.program_id(1)

    @pl.when(ni == 0)
    def _init():
        sum_ref[...] = jnp.zeros_like(sum_ref)
        sq_ref[...] = jnp.zeros_like(sq_ref)

    ones = ones_ref[...]                                   # (L, 1) f32, resident
    # Lane reduction on the (otherwise idle) MXU: vmatmul pushes use the free
    # 'vector extended' slots and accumulate in f32; precision=HIGHEST keeps
    # ~f32 accuracy on the bf16-multipass chips (v5e/v6e).
    for t in range(x_ref.shape[0]):                        # TN is small & static (<= 8)
        xt = x_ref[t].astype(jnp.float32)                  # (TC, L); widen in-kernel
        sum_ref[...] += jnp.dot(xt, ones,
                                precision=jax.lax.Precision.HIGHEST,
                                preferred_element_type=jnp.float32)
        sq_ref[...] += jnp.dot(xt * xt, ones,
                               precision=jax.lax.Precision.HIGHEST,
                               preferred_element_type=jnp.float32)

    @pl.when(ni == pl.num_programs(1) - 1)
    def _finalize():
        mean = sum_ref[...] * inv_count                    # global 1/(N*H*W)
        # Biased variance (BN training); clamp to avoid cancellation -> NaN.
        var = jnp.maximum(sq_ref[...] * inv_count - mean * mean, 0.0)
        inv_std = jax.lax.rsqrt(var + BN_EPS)
        scale = gamma_ref[...] * inv_std                   # (TC, 1)
        scale_ref[...] = scale
        shift_ref[...] = beta_ref[...] - mean * scale


def _vmem_capacity_bytes():
    """Per-core VMEM capacity; conservative (v7x-sized) fallback if unavailable."""
    try:
        cap = getattr(pltpu.get_tpu_info(), "vmem_capacity_bytes", None)
        if cap:
            return int(cap)
    except Exception:
        pass
    return 64 << 20


def _pick_tiles(n, c, l, itemsize, budget_bytes):
    """Choose (tc, tn): channel-tile and batch-block sizes.

    tc divides C (multiple of 8 when possible; C itself for tiny/odd C), tn
    divides N (<= 8).  The x double-buffer 2*tn*tc*l*itemsize must fit the
    budget; prefer an even number >= 2 of channel tiles (v7x megacore) and grow
    tn until the per-step block reaches ~4 MiB.
    """
    cands = [d for d in range(8, c + 1, 8) if c % d == 0]
    if not cands:
        cands = [c]                                        # tiny / non-8-divisible C

    def fits(tc, tn):
        return 2 * tn * tc * l * itemsize <= budget_bytes

    tc = None
    for pref in (lambda t: (c // t) >= 2 and (c // t) % 2 == 0,  # even #tiles (megacore)
                 lambda t: (c // t) >= 2,
                 lambda t: True):
        ok = [t for t in cands if pref(t) and fits(t, 1)]
        if ok:
            tc = max(ok)
            break
    if tc is None:
        tc = min(cands)                                    # bounded fallback

    tn = 1
    for d in range(2, min(n, 8) + 1):
        if n % d == 0 and fits(tc, d) and d * tc * l * itemsize <= (4 << 20):
            tn = d
    return tc, tn


def bnneck_head(features, gamma, beta):
    """features: (N, C, H, W). Returns (N, C) = BatchNorm2d(features)[..., 0, 0]
    using training-mode (batch) statistics, matching the PyTorch forward."""
    n, c, h, w = features.shape
    l = h * w
    itemsize = jnp.dtype(features.dtype).itemsize

    cap = _vmem_capacity_bytes()
    # ~56 MiB of buffers on 128-MiB VMEM parts (v5e/v6e), ~28 MiB on v7x (64 MiB).
    budget = min(56 << 20, max(cap // 2 - (4 << 20), 12 << 20))
    tc, tn = _pick_tiles(n, c, l, itemsize, budget)

    x3 = features.reshape(n, c, l)                         # free view of NCHW
    ones = jnp.ones((l, 1), jnp.float32)                   # MXU reduction RHS (resident)
    gamma_c = gamma.reshape(c, 1).astype(jnp.float32)
    beta_c = beta.reshape(c, 1).astype(jnp.float32)

    inv_count = 1.0 / float(n * l)                         # global count (biased var)

    step_bytes = tn * tc * l * itemsize
    n_bsteps = n // tn
    # Deeper buffering when per-step blocks are small and the batch pipeline is
    # long (v7x: a 1 MiB block drains in ~0.3 us, comparable to the ~0.35 us
    # per-step overhead).
    n_buf = 3 if (step_bytes < (2 << 20) and n_bsteps >= 4) else 2
    x_idx = lambda ci, ni: (ni, ci, 0)
    if n_buf == 2:
        x_spec = pl.BlockSpec((tn, tc, l), x_idx)
    else:
        try:
            x_spec = pl.BlockSpec((tn, tc, l), x_idx, pipeline_mode=pl.Buffered(n_buf))
        except Exception:                                  # jax without pipeline_mode
            n_buf = 2
            x_spec = pl.BlockSpec((tn, tc, l), x_idx)

    need = n_buf * step_bytes + l * 4 + 12 * tc * 4 + (2 << 20)
    vmem_limit = int(min(max(need, 16 << 20), max(cap - (8 << 20), 24 << 20)))

    grid = (c // tc, n_bsteps)

    scale, shift = pl.pallas_call(
        functools.partial(bnneck_stats_kernel, inv_count=inv_count),
        out_shape=(jax.ShapeDtypeStruct((c, 1), jnp.float32),
                   jax.ShapeDtypeStruct((c, 1), jnp.float32)),
        grid_spec=pltpu.PrefetchScalarGridSpec(
            num_scalar_prefetch=0,
            grid=grid,
            in_specs=[
                # (N, C, L): TN batch elements, one channel tile, full spatial extent.
                x_spec,
                # Constant across the grid -> fetched once, resident in VMEM.
                pl.BlockSpec((l, 1), lambda ci, ni: (0, 0)),
                pl.BlockSpec((tc, 1), lambda ci, ni: (ci, 0)),
                pl.BlockSpec((tc, 1), lambda ci, ni: (ci, 0)),
            ],
            out_specs=[
                pl.BlockSpec((tc, 1), lambda ci, ni: (ci, 0)),
                pl.BlockSpec((tc, 1), lambda ci, ni: (ci, 0)),
            ],
            scratch_shapes=[
                pltpu.VMEM((tc, 1), jnp.float32),          # running sum
                pltpu.VMEM((tc, 1), jnp.float32),          # running sum of squares
            ],
        ),
        compiler_params=pltpu.CompilerParams(
            dimension_semantics=("parallel", "arbitrary"),
            vmem_limit_bytes=vmem_limit,
        ),
    )(x3, ones, gamma_c, beta_c)

    # Tiny epilogue (N*C elements, <1% of traffic): BN affine at spatial (0, 0).
    x00 = features[:, :, 0, 0].astype(jnp.float32)         # (N, C)
    y = x00 * scale[:, 0][None, :] + shift[:, 0][None, :]
    return y.astype(features.dtype)


def reference(features, gamma, beta):
    # Plain-JAX reference of training-mode BatchNorm2d + [..., 0, 0]
    x = features.astype(jnp.float32)
    mean = jnp.mean(x, axis=(0, 2, 3))
    var = jnp.mean((x - mean[None, :, None, None]) ** 2, axis=(0, 2, 3))
    xn = (x - mean[None, :, None, None]) / jnp.sqrt(var[None, :, None, None] + BN_EPS)
    y = xn * gamma[None, :, None, None] + beta[None, :, None, None]
    return y[..., 0, 0]


if __name__ == "__main__":
    key = jax.random.PRNGKey(0)
    k_x, k_g, k_x2, k_g2 = jax.random.split(key, 4)

    # Small shape consistent with the module (single channel tile, TN-blocked batch).
    N, C, H, W = 2, 8, 16, 16
    features = jax.random.normal(k_x, (N, C, H, W), dtype=jnp.float32)
    # weights_init_kaiming for BatchNorm: weight ~ N(1.0, 0.02), bias = 0
    gamma = 1.0 + 0.02 * jax.random.normal(k_g, (C,), dtype=jnp.float32)
    beta = jnp.zeros((C,), dtype=jnp.float32)   # requires_grad_(False): no fwd effect

    out = jax.block_until_ready(bnneck_head(features, gamma, beta))
    ref = reference(features, gamma, beta)
    assert out.shape == (N, C)
    assert jnp.allclose(out, ref, atol=2e-4, rtol=2e-4), (out, ref)

    # Larger shape: multiple channel tiles and multiple batch steps, exercising
    # the init / accumulate / finalize path over the 'arbitrary' batch axis.
    N2, C2, H2, W2 = 16, 256, 8, 16
    features2 = jax.random.normal(k_x2, (N2, C2, H2, W2), dtype=jnp.float32)
    gamma2 = 1.0 + 0.02 * jax.random.normal(k_g2, (C2,), dtype=jnp.float32)
    beta2 = jnp.zeros((C2,), dtype=jnp.float32)

    out2 = jax.block_until_ready(bnneck_head(features2, gamma2, beta2))
    ref2 = reference(features2, gamma2, beta2)
    assert out2.shape == (N2, C2)
    assert jnp.allclose(out2, ref2, atol=2e-4, rtol=2e-4)

    print("KERNEL_OK")
</pallas_src>

<mosaic_0001>
module attributes {stable_mosaic.version = 11 : i64} {
  func.func @bnneck_stats_kernel(%arg0: i32, %arg1: i32, %arg2: memref<2x8x256xf32, #tpu.memory_space<vmem>>, %arg3: memref<256x1xf32, #tpu.memory_space<vmem>>, %arg4: memref<8x1xf32, #tpu.memory_space<vmem>>, %arg5: memref<8x1xf32, #tpu.memory_space<vmem>>, %arg6: memref<8x1xf32, #tpu.memory_space<vmem>>, %arg7: memref<8x1xf32, #tpu.memory_space<vmem>>, %arg8: memref<8x1xf32, #tpu.memory_space<vmem>>, %arg9: memref<8x1xf32, #tpu.memory_space<vmem>>) attributes {dimension_semantics = [#tpu.dimension_semantics<parallel>, #tpu.dimension_semantics<arbitrary>], iteration_bounds = array<i64: 1, 1>, scalar_prefetch = 0 : i64, scratch_operands = 2 : i64, tpu.core_type = #tpu.core_type<tc>, window_params = [{transform_indices = @transform_0, window_bounds = array<i64: 2, 8, 256>}, {pipeline_mode = #tpu.pipeline_mode<synchronous>, transform_indices = @transform_1, window_bounds = array<i64: 256, 1>}, {transform_indices = @transform_2, window_bounds = array<i64: 8, 1>}, {transform_indices = @transform_3, window_bounds = array<i64: 8, 1>}, {transform_indices = @transform_4, window_bounds = array<i64: 8, 1>}, {transform_indices = @transform_5, window_bounds = array<i64: 8, 1>}]} {
    %c0_i32 = arith.constant 0 : i32
    %0 = arith.cmpi eq, %arg1, %c0_i32 : i32
    %1 = arith.extui %0 : i1 to i32
    %c0_i32_0 = arith.constant 0 : i32
    %2 = arith.cmpi ne, %1, %c0_i32_0 : i32
    scf.if %2 {
      %cst_28 = arith.constant 0.000000e+00 : f32
      %29 = vector.broadcast %cst_28 : f32 to vector<8x1xf32>
      %c0_29 = arith.constant 0 : index
      %c0_30 = arith.constant 0 : index
      %30 = vector.load %arg8[%c0_29, %c0_30] : memref<8x1xf32, #tpu.memory_space<vmem>>, vector<8x1xf32>
      tpu.vector_store %arg8[%c0_29, %c0_30], %29 {strides = array<i32>} : memref<8x1xf32, #tpu.memory_space<vmem>>, vector<8x1xf32>,
      %cst_31 = arith.constant 0.000000e+00 : f32
      %31 = vector.broadcast %cst_31 : f32 to vector<8x1xf32>
      %c0_32 = arith.constant 0 : index
      %c0_33 = arith.constant 0 : index
      %32 = vector.load %arg9[%c0_32, %c0_33] : memref<8x1xf32, #tpu.memory_space<vmem>>, vector<8x1xf32>
      tpu.vector_store %arg9[%c0_32, %c0_33], %31 {strides = array<i32>} : memref<8x1xf32, #tpu.memory_space<vmem>>, vector<8x1xf32>,
    } else {
    }
    %c0 = arith.constant 0 : index
    %c0_1 = arith.constant 0 : index
    %3 = vector.load %arg3[%c0, %c0_1] : memref<256x1xf32, #tpu.memory_space<vmem>>, vector<256x1xf32>
    %c0_2 = arith.constant 0 : index
    %c0_3 = arith.constant 0 : index
    %c0_4 = arith.constant 0 : index
    %4 = vector.load %arg2[%c0_2, %c0_3, %c0_4] : memref<2x8x256xf32, #tpu.memory_space<vmem>>, vector<1x8x256xf32>
    %5 = vector.shape_cast %4 : vector<1x8x256xf32> to vector<8x256xf32>
    %c0_5 = arith.constant 0 : index
    %c0_6 = arith.constant 0 : index
    %6 = vector.load %arg8[%c0_5, %c0_6] : memref<8x1xf32, #tpu.memory_space<vmem>>, vector<8x1xf32>
    %cst = arith.constant dense<0.000000e+00> : vector<8x1xf32>
    %7 = tpu.matmul %5, %3, %cst {dimension_numbers = #tpu.dot_dimension_numbers<[1], [0], [0], [1], [0, 0, 1, 1], [], []>, precision = #tpu.contract_precision<fp32>} : vector<8x256xf32>, vector<256x1xf32>, vector<8x1xf32> -> vector<8x1xf32>
    %8 = arith.addf %6, %7 : vector<8x1xf32>
    %c0_7 = arith.constant 0 : index
    %c0_8 = arith.constant 0 : index
    %9 = vector.load %arg8[%c0_7, %c0_8] : memref<8x1xf32, #tpu.memory_space<vmem>>, vector<8x1xf32>
    tpu.vector_store %arg8[%c0_7, %c0_8], %8 {strides = array<i32>} : memref<8x1xf32, #tpu.memory_space<vmem>>, vector<8x1xf32>,
    %c0_9 = arith.constant 0 : index
    %c0_10 = arith.constant 0 : index
    %10 = vector.load %arg9[%c0_9, %c0_10] : memref<8x1xf32, #tpu.memory_space<vmem>>, vector<8x1xf32>
    %11 = arith.mulf %5, %5 : vector<8x256xf32>
    %cst_11 = arith.constant dense<0.000000e+00> : vector<8x1xf32>
    %12 = tpu.matmul %11, %3, %cst_11 {dimension_numbers = #tpu.dot_dimension_numbers<[1], [0], [0], [1], [0, 0, 1, 1], [], []>, precision = #tpu.contract_precision<fp32>} : vector<8x256xf32>, vector<256x1xf32>, vector<8x1xf32> -> vector<8x1xf32>
    %13 = arith.addf %10, %12 : vector<8x1xf32>
    %c0_12 = arith.constant 0 : index
    %c0_13 = arith.constant 0 : index
    %14 = vector.load %arg9[%c0_12, %c0_13] : memref<8x1xf32, #tpu.memory_space<vmem>>, vector<8x1xf32>
    tpu.vector_store %arg9[%c0_12, %c0_13], %13 {strides = array<i32>} : memref<8x1xf32, #tpu.memory_space<vmem>>, vector<8x1xf32>,
    %c1 = arith.constant 1 : index
    %c0_14 = arith.constant 0 : index
    %c0_15 = arith.constant 0 : index
    %15 = vector.load %arg2[%c1, %c0_14, %c0_15] : memref<2x8x256xf32, #tpu.memory_space<vmem>>, vector<1x8x256xf32>
    %16 = vector.shape_cast %15 : vector<1x8x256xf32> to vector<8x256xf32>
    %c0_16 = arith.constant 0 : index
    %c0_17 = arith.constant 0 : index
    %17 = vector.load %arg8[%c0_16, %c0_17] : memref<8x1xf32, #tpu.memory_space<vmem>>, vector<8x1xf32>
    %cst_18 = arith.constant dense<0.000000e+00> : vector<8x1xf32>
    %18 = tpu.matmul %16, %3, %cst_18 {dimension_numbers = #tpu.dot_dimension_numbers<[1], [0], [0], [1], [0, 0, 1, 1], [], []>, precision = #tpu.contract_precision<fp32>} : vector<8x256xf32>, vector<256x1xf32>, vector<8x1xf32> -> vector<8x1xf32>
    %19 = arith.addf %17, %18 : vector<8x1xf32>
    %c0_19 = arith.constant 0 : index
    %c0_20 = arith.constant 0 : index
    %20 = vector.load %arg8[%c0_19, %c0_20] : memref<8x1xf32, #tpu.memory_space<vmem>>, vector<8x1xf32>
    tpu.vector_store %arg8[%c0_19, %c0_20], %19 {strides = array<i32>} : memref<8x1xf32, #tpu.memory_space<vmem>>, vector<8x1xf32>,
    %c0_21 = arith.constant 0 : index
    %c0_22 = arith.constant 0 : index
    %21 = vector.load %arg9[%c0_21, %c0_22] : memref<8x1xf32, #tpu.memory_space<vmem>>, vector<8x1xf32>
    %22 = arith.mulf %16, %16 : vector<8x256xf32>
    %cst_23 = arith.constant dense<0.000000e+00> : vector<8x1xf32>
    %23 = tpu.matmul %22, %3, %cst_23 {dimension_numbers = #tpu.dot_dimension_numbers<[1], [0], [0], [1], [0, 0, 1, 1], [], []>, precision = #tpu.contract_precision<fp32>} : vector<8x256xf32>, vector<256x1xf32>, vector<8x1xf32> -> vector<8x1xf32>
    %24 = arith.addf %21, %23 : vector<8x1xf32>
    %c0_24 = arith.constant 0 : index
    %c0_25 = arith.constant 0 : index
    %25 = vector.load %arg9[%c0_24, %c0_25] : memref<8x1xf32, #tpu.memory_space<vmem>>, vector<8x1xf32>
    tpu.vector_store %arg9[%c0_24, %c0_25], %24 {strides = array<i32>} : memref<8x1xf32, #tpu.memory_space<vmem>>, vector<8x1xf32>,
    %c0_i32_26 = arith.constant 0 : i32
    %26 = arith.cmpi eq, %arg1, %c0_i32_26 : i32
    %27 = arith.extui %26 : i1 to i32
    %c0_i32_27 = arith.constant 0 : i32
    %28 = arith.cmpi ne, %27, %c0_i32_27 : i32
    scf.if %28 {
      %c0_28 = arith.constant 0 : index
      %c0_29 = arith.constant 0 : index
      %29 = vector.load %arg8[%c0_28, %c0_29] : memref<8x1xf32, #tpu.memory_space<vmem>>, vector<8x1xf32>
      %cst_30 = arith.constant 0.001953125 : f32
      %30 = vector.broadcast %cst_30 : f32 to vector<8x1xf32>
      %31 = arith.mulf %29, %30 : vector<8x1xf32>
      %c0_31 = arith.constant 0 : index
      %c0_32 = arith.constant 0 : index
      %32 = vector.load %arg9[%c0_31, %c0_32] : memref<8x1xf32, #tpu.memory_space<vmem>>, vector<8x1xf32>
      %cst_33 = arith.constant 0.001953125 : f32
      %33 = vector.broadcast %cst_33 : f32 to vector<8x1xf32>
      %34 = arith.mulf %32, %33 : vector<8x1xf32>
      %35 = arith.mulf %31, %31 : vector<8x1xf32>
      %36 = arith.subf %34, %35 : vector<8x1xf32>
      %cst_34 = arith.constant 0.000000e+00 : f32
      %37 = vector.broadcast %cst_34 : f32 to vector<8x1xf32>
      %38 = arith.maximumf %36, %37 : vector<8x1xf32>
      %cst_35 = arith.constant 9.99999974E-6 : f32
      %39 = vector.broadcast %cst_35 : f32 to vector<8x1xf32>
      %40 = arith.addf %38, %39 : vector<8x1xf32>
      %41 = math.rsqrt %40 : vector<8x1xf32>
      %c0_36 = arith.constant 0 : index
      %c0_37 = arith.constant 0 : index
      %42 = vector.load %arg4[%c0_36, %c0_37] : memref<8x1xf32, #tpu.memory_space<vmem>>, vector<8x1xf32>
      %43 = arith.mulf %42, %41 : vector<8x1xf32>
      %c0_38 = arith.constant 0 : index
      %c0_39 = arith.constant 0 : index
      %44 = vector.load %arg6[%c0_38, %c0_39] : memref<8x1xf32, #tpu.memory_space<vmem>>, vector<8x1xf32>
      tpu.vector_store %arg6[%c0_38, %c0_39], %43 {strides = array<i32>} : memref<8x1xf32, #tpu.memory_space<vmem>>, vector<8x1xf32>,
      %c0_40 = arith.constant 0 : index
      %c0_41 = arith.constant 0 : index
      %45 = vector.load %arg5[%c0_40, %c0_41] : memref<8x1xf32, #tpu.memory_space<vmem>>, vector<8x1xf32>
      %46 = arith.mulf %31, %43 : vector<8x1xf32>
      %47 = arith.subf %45, %46 : vector<8x1xf32>
      %c0_42 = arith.constant 0 : index
      %c0_43 = arith.constant 0 : index
      %48 = vector.load %arg7[%c0_42, %c0_43] : memref<8x1xf32, #tpu.memory_space<vmem>>, vector<8x1xf32>
      tpu.vector_store %arg7[%c0_42, %c0_43], %47 {strides = array<i32>} : memref<8x1xf32, #tpu.memory_space<vmem>>, vector<8x1xf32>,
    } else {
    }
    return
  }
  func.func @transform_0(%arg0: i32, %arg1: i32) -> (i32, i32, i32) {
    %c0_i32 = arith.constant 0 : i32
    %c0_i32_0 = arith.constant 0 : i32
    return %arg1, %arg0, %c0_i32 : i32, i32, i32
  }
  func.func @transform_1(%arg0: i32, %arg1: i32) -> (i32, i32) {
    %c0_i32 = arith.constant 0 : i32
    %c0_i32_0 = arith.constant 0 : i32
    %c0_i32_1 = arith.constant 0 : i32
    return %c0_i32, %c0_i32_0 : i32, i32
  }
  func.func @transform_2(%arg0: i32, %arg1: i32) -> (i32, i32) {
    %c0_i32 = arith.constant 0 : i32
    %c0_i32_0 = arith.constant 0 : i32
    return %arg0, %c0_i32 : i32, i32
  }
  func.func @transform_3(%arg0: i32, %arg1: i32) -> (i32, i32) {
    %c0_i32 = arith.constant 0 : i32
    %c0_i32_0 = arith.constant 0 : i32
    return %arg0, %c0_i32 : i32, i32
  }
  func.func @transform_4(%arg0: i32, %arg1: i32) -> (i32, i32) {
    %c0_i32 = arith.constant 0 : i32
    %c0_i32_0 = arith.constant 0 : i32
    return %arg0, %c0_i32 : i32, i32
  }
  func.func @transform_5(%arg0: i32, %arg1: i32) -> (i32, i32) {
    %c0_i32 = arith.constant 0 : i32
    %c0_i32_0 = arith.constant 0 : i32
    return %arg0, %c0_i32 : i32, i32
  }
}

</mosaic_0001>

<bundles_post_ra>
// kernel: tpu_custom_call.1
= control target key start
LH: loop header
LB: loop body
LE: loop exit
PB: predicated region body
PF: predicated region fallthrough
CT: control target
= control target key end

     0   :  { %vm23_vm0 = vcmask 7168   ;;  %s5947_s1 = inlined_call_operand.vmem [shape: f32[256,1], index: 1, kind: input, shape index: {}]   ;;  %s5948_s0 = inlined_call_operand.vmem [shape: f32[2,8,256], index: 0, kind: input, shape index: {}]   ;;  %s5949_s2 = inlined_call_operand.vmem [shape: f32[8,1], index: 2, kind: input, shape index: {}]   ;;  %s5950_s3 = inlined_call_operand.vmem [shape: f32[8,1], index: 3, kind: input, shape index: {}]   ;;  %s5951_s4 = inlined_call_operand.vmem [shape: f32[8,1], index: 4, kind: output, shape index: {0}]   ;;  %s5952_s5 = inlined_call_operand.vmem [shape: f32[8,1], index: 5, kind: output, shape index: {1}]  }
   0x1   :  { %v57_v0 = vld [vmem:[%s5947_s1 + $0xf8] sm:$0xff]  ;;  %v56_v2 = vld [vmem:[%s5947_s1 + $0xf0] sm:$0xff]  ;;  %v55_v7 = vld [vmem:[%s5947_s1 + $0xe8] sm:$0xff] }
   0x2   :  { %v41_v1 = vld [vmem:[%s5947_s1 + $0x78] sm:$0xff]  ;;  %v4440_v3 = vand.u32 4294901760, %v57_v0  ;;  %v4444_v5 = vand.u32 4294901760, %v56_v2  ;;  %v40_v6 = vld [vmem:[%s5947_s1 + $0x70] sm:$0xff]  ;;  %v39_v8 = vld [vmem:[%s5947_s1 + $0x68] sm:$0xff]  ;;  %v4457_v10 = vand.u32 4294901760, %v55_v7 }
   0x3   :  { %v4442_v4 = vand.u32 4294901760, %v41_v1  ;;  %v4455_v9 = vand.u32 4294901760, %v40_v6  ;;  %v4459_v11 = vand.u32 4294901760, %v39_v8  ;;  %v54_v12 = vld [vmem:[%s5947_s1 + $0xe0] sm:$0xff]  ;;  %v53_v14 = vld [vmem:[%s5947_s1 + $0xd8] sm:$0xff]  ;;  %v4488_v20 = vld [vmem:[%s5947_s1 + $0xd0] sm:$0xff] }
   0x4   :  { %v38_v13 = vld [vmem:[%s5947_s1 + $0x60] sm:$0xff]  ;;  %3557 = vmatprep.subr.mxu0 %v4440_v3  ;;  %v4471_v15 = vand.u32 4294901760, %v54_v12  ;;  %v4475_v17 = vand.u32 4294901760, %v53_v14  ;;  %v4478_v18 = vsub.f32 %v57_v0, %v4440_v3  ;;  %v4483_v19 = vld [vmem:[%s5947_s1 + $0x58] sm:$0xff]  ;;  %v4493_v21 = vld [vmem:[%s5947_s1 + $0x50] sm:$0xff]  ;;  %v4503_v24 = vand.u32 4294901760, %v4488_v20 }
   0x5   :  { %v4473_v16 = vand.u32 4294901760, %v38_v13  ;;  %3558 = vmatpush3.msra.mxu0 %v4442_v4  ;;  %v4497_v22 = vand.u32 4294901760, %v4483_v19  ;;  %v4500_v23 = vsub.f32 %v41_v1, %v4442_v4  ;;  %v4506_v25 = vsub.f32 %v56_v2, %v4444_v5  ;;  %v4511_v26 = vld [vmem:[%s5947_s1 + $0xc8] sm:$0xff]  ;;  %v4521_v28 = vld [vmem:[%s5947_s1 + $0xc0] sm:$0xff]  ;;  %v4580_v46 = vld [vmem:[%s5947_s1 + $0xb8] sm:$0xff] }
   0x6   :  { %6170 = vst [vmem:[#allocation4_spill] sm:$0xff] %v4478_v18  ;;  %v4516_v27 = vld [vmem:[%s5947_s1 + $0x48] sm:$0xff]  ;;  %3559 = vmatprep.subr.mxu0 %v4444_v5  ;;  %v4525_v29 = vand.u32 4294901760, %v4478_v18  ;;  %v4528_v30 = vand.u32 4294901760, %v4493_v21  ;;  %v4531_v31 = vsub.f32 %v40_v6, %v4455_v9  ;;  %v4534_v32 = vand.u32 4294901760, %v4511_v26  ;;  %v4552_v37 = vld [vmem:[%s5947_s1 + $0x40] sm:$0xff] }
   0x7   :  { %3560 = vmatpush3.msra.mxu0 %v4455_v9  ;;  %v4538_v33 = vand.u32 4294901760, %v4500_v23  ;;  %v4541_v34 = vand.u32 4294901760, %v4506_v25  ;;  %v4544_v35 = vsub.f32 %v55_v7, %v4457_v10  ;;  %v4547_v36 = vand.u32 4294901760, %v4516_v27  ;;  %v4596_v51 = vld [vmem:[%s5947_s1 + $0x38] sm:$0xff]  ;;  %v4611_v56 = vld [vmem:[%s5947_s1 + $0xb0] sm:$0xff]  ;;  %v4645_v2 = vld [vmem:[%s5947_s1 + $0xa8] sm:$0xff] }
   0x8   :  { %6171 = vst [vmem:[#allocation5_spill] sm:$0xff] %v4525_v29  ;;  %6172 = vst [vmem:[#allocation6_spill] sm:$0xff] %v4528_v30  ;;  %3561 = vmatprep.subr.mxu0 %v4457_v10  ;;  %v289_v38 = vsub.f32 %v4478_v18, %v4525_v29  ;;  %v4558_v39 = vand.u32 4294901760, %v4531_v31  ;;  %v4561_v40 = vsub.f32 %v39_v8, %v4459_v11  ;;  %v4564_v41 = vand.u32 4294901760, %v4521_v28  ;;  %v4628_v61 = vld [vmem:[%s5947_s1 + $0x30] sm:$0xff] }
   0x9   :  { %6173 = vst [vmem:[#allocation7_spill] sm:$0xff] %v4531_v31  ;;  %6174 = vst [vmem:[#allocation8_spill] sm:$0xff] %v4534_v32  ;;  %3562 = vmatpush3.msra.mxu0 %v4459_v11  ;;  %v177_v42 = vsub.f32 %v4500_v23, %v4538_v33  ;;  %v296_v43 = vsub.f32 %v4506_v25, %v4541_v34  ;;  %v4572_v44 = vand.u32 4294901760, %v4544_v35  ;;  %v4591_v50 = vand.u32 4294901760, %v4552_v37 }
   0xa   :  { %6175 = vst [vmem:[#allocation9_spill] sm:$0xff] %v4538_v33  ;;  %6176 = vst [vmem:[#allocation10_spill] sm:$0xff] %v4541_v34  ;;  %v4575_v45 = vsub.f32 %v54_v12, %v4471_v15  ;;  %3563 = vmatprep.subr.mxu0 %v4471_v15  ;;  %v4583_v47 = vand.u32 4294901760, %v289_v38  ;;  %v184_v48 = vsub.f32 %v4531_v31, %v4558_v39  ;;  %v4588_v49 = vand.u32 4294901760, %v4561_v40  ;;  %v4817_v33 = vld [vmem:[%s5947_s1 + $0x88] sm:$0xff] }
   0xb   :  { %6177 = vst [vmem:[#allocation11_spill] sm:$0xff] %v4544_v35  ;;  %6178 = vst [vmem:[#allocation12_spill] sm:$0xff] %v4547_v36  ;;  %3564 = vmatpush3.msra.mxu0 %v4473_v16  ;;  %v4599_v52 = vand.u32 4294901760, %v177_v42  ;;  %v4601_v53 = vand.u32 4294901760, %v296_v43  ;;  %v303_v54 = vsub.f32 %v4544_v35, %v4572_v44  ;;  %v4620_v59 = vsub.f32 %v38_v13, %v4473_v16  ;;  %v4664_v13 = vld [vmem:[%s5947_s1 + $0x28] sm:$0xff] }
   0xc   :  { %6179 = vst [vmem:[#allocation13_spill] sm:$0xff] %v4558_v39  ;;  %6180 = vst [vmem:[#allocation14_spill] sm:$0xff] %v4561_v40  ;;  %v4606_v55 = vand.u32 4294901760, %v4575_v45  ;;  %3565 = vmatprep.subr.mxu0 %v4475_v17  ;;  %3592 = vmatprep.subr.mxu1 %v4583_v47  ;;  %v4615_v57 = vand.u32 4294901760, %v184_v48  ;;  %v191_v58 = vsub.f32 %v4561_v40, %v4588_v49  ;;  %v4623_v60 = vand.u32 4294901760, %v4580_v46  ;;  %v4798_v39 = vld [vmem:[%s5947_s1 + $0x10] sm:$0xff] }
   0xd   :  { %6181 = vst [vmem:[#allocation15_spill] sm:$0xff] %v4564_v41  ;;  %6182 = vst [vmem:[#allocation16_spill] sm:$0xff] %v4572_v44  ;;  %3566 = vmatpush3.msra.mxu0 %v4497_v22  ;;  %3593 = vmatpush3.msra.mxu1 %v4599_v52  ;;  %v4632_v62 = vand.u32 4294901760, %v303_v54  ;;  %v4637_v0 = vsub.f32 %v53_v14, %v4475_v17  ;;  %v4640_v1 = vand.u32 4294901760, %v4596_v51  ;;  %v4652_v7 = vand.u32 4294901760, %v4620_v59  ;;  %v4781_v44 = vld [vmem:[%s5947_s1 + $0x90] sm:$0xff] }
   0xe   :  { %6183 = vst [vmem:[#allocation17_spill] sm:$0xff] %v4575_v45  ;;  %6184 = vst [vmem:[#allocation18_spill] sm:$0xff] %v4583_v47  ;;  %v310_v63 = vsub.f32 %v4575_v45, %v4606_v55  ;;  %3567 = vmatprep.subr.mxu0 %v4503_v24  ;;  %3594 = vmatprep.subr.mxu1 %v4601_v53  ;;  %v4649_v6 = vand.u32 4294901760, %v191_v58  ;;  %v4656_v8 = vsub.f32 %v4483_v19, %v4497_v22  ;;  %v4697_v58 = vld [vmem:[%s5947_s1 + $0xa0] sm:$0xff] }
   0xf   :  { %6185 = vst [vmem:[#allocation19_spill] sm:$0xff] %v4588_v49  ;;  %6186 = vst [vmem:[#allocation20_spill] sm:$0xff] %v4591_v50  ;;  %v4659_v12 = vand.u32 4294901760, %v4611_v56  ;;  %3568 = vmatpush3.msra.mxu0 %v4528_v30  ;;  %3595 = vmatpush3.msra.mxu1 %v4615_v57  ;;  %v4671_v38 = vand.u32 4294901760, %v4637_v0  ;;  %v4675_v19 = vsub.f32 %v4488_v20, %v4503_v24  ;;  %v4678_v42 = vand.u32 4294901760, %v4628_v61  ;;  %v4763_v49 = vld [vmem:[%s5947_s1 + $0x18] sm:$0xff] }
  0x10   :  { %6187 = vst [vmem:[#allocation21_spill] sm:$0xff] %v4599_v52  ;;  %6188 = vst [vmem:[#allocation22_spill] sm:$0xff] %v4601_v53  ;;  %v4668_v14 = vand.u32 4294901760, %v310_v63  ;;  %3569 = vmatprep.subr.mxu0 %v4534_v32  ;;  %3596 = vmatprep.subr.mxu1 %v4632_v62  ;;  %v198_v43 = vsub.f32 %v4620_v59, %v4652_v7  ;;  %v4685_v48 = vand.u32 4294901760, %v4656_v8  ;;  %v4692_v20 = vand.u32 4294901760, %v4645_v2 }
  0x11   :  { %6189 = vst [vmem:[#allocation23_spill] sm:$0xff] %v4606_v55  ;;  %6190 = vst [vmem:[#allocation24_spill] sm:$0xff] %v4615_v57  ;;  %v4689_v54 = vsub.f32 %v4493_v21, %v4528_v30  ;;  %3570 = vmatpush3.msra.mxu0 %v4547_v36  ;;  %3597 = vmatpush3.msra.mxu1 %v4649_v6  ;;  %v317_v63 = vsub.f32 %v4637_v0, %v4671_v38  ;;  %v4711_v57 = vand.u32 4294901760, %v4664_v13 }
  0x12   :  { %6191 = vst [vmem:[#allocation25_spill] sm:$0xff] %v4620_v59  ;;  %6192 = vst [vmem:[#allocation26_spill] sm:$0xff] %v4623_v60  ;;  %v4708_v21 = vsub.f32 %v4511_v26, %v4534_v32  ;;  %3571 = vmatprep.subr.mxu0 %v4564_v41  ;;  %3598 = vmatprep.subr.mxu1 %v4668_v14  ;;  %v4715_v53 = vand.u32 4294901760, %v198_v43  ;;  %v4724_v47 = vsub.f32 %v4516_v27, %v4547_v36  ;;  %v4729_v26 = vld [vmem:[%s5947_s1 + $0x20] sm:$0xff]  ;;  %v4745_v27 = vld [vmem:[%s5947_s1 + $0x98] sm:$0xff] }
  0x13   :  { %6193 = vst [vmem:[#allocation27_spill] sm:$0xff] %v4632_v62  ;;  %6194 = vst [vmem:[#allocation28_spill] sm:$0xff] %v4637_v0  ;;  %v4704_v62 = vand.u32 4294901760, %v4675_v19  ;;  %v4720_v52 = vand.u32 4294901760, %v4689_v54  ;;  %3572 = vmatpush3.msra.mxu0 %v4591_v50  ;;  %v4758_v55 = vsub.f32 %v4521_v28, %v4564_v41  ;;  %v4776_v28 = vsub.f32 %v4552_v37, %v4591_v50 }
  0x14   :  { %6195 = vst [vmem:[#allocation29_spill] sm:$0xff] %v4640_v1  ;;  %6196 = vst [vmem:[#allocation30_spill] sm:$0xff] %v4649_v6  ;;  %v205_v6 = vsub.f32 %v4656_v8, %v4685_v48  ;;  %3599 = vmatpush3.msra.mxu1 %v4715_v53  ;;  %3573 = vmatprep.subr.mxu0 %v4623_v60  ;;  %v4793_v37 = vand.u32 4294901760, %v4745_v27  ;;  %v4812_v34 = vand.u32 4294901760, %v4763_v49  ;;  %v4830_v29 = vand.u32 4294901760, %v4781_v44 }
  0x15   :  { %6197 = vst [vmem:[#allocation31_spill] sm:$0xff] %v4652_v7  ;;  %6198 = vst [vmem:[#allocation32_spill] sm:$0xff] %v4656_v8  ;;  %v324_v43 = vsub.f32 %v4675_v19, %v4704_v62  ;;  %v4754_v7 = vand.u32 4294901760, %v4724_v47  ;;  %3574 = vmatpush3.msra.mxu0 %v4640_v1 }
  0x16   :  { %6199 = vst [vmem:[#allocation33_spill] sm:$0xff] %v4659_v12  ;;  %6200 = vst [vmem:[#allocation34_spill] sm:$0xff] %v4668_v14  ;;  %v4732_v14 = vand.u32 4294901760, %v317_v63  ;;  %v4749_v63 = vand.u32 4294901760, %v205_v6  ;;  %3575 = vmatprep.subr.mxu0 %v4659_v12 }
  0x17   :  { %6201 = vst [vmem:[#allocation35_spill] sm:$0xff] %v4671_v38  ;;  %6202 = vst [vmem:[#allocation36_spill] sm:$0xff] %v4675_v19  ;;  %v4740_v38 = vand.u32 4294901760, %v4697_v58  ;;  %v4767_v6 = vand.u32 4294901760, %v324_v43  ;;  %3576 = vmatpush3.msra.mxu0 %v4678_v42 }
  0x18   :  { %6203 = vst [vmem:[#allocation37_spill] sm:$0xff] %v4678_v42  ;;  %6204 = vst [vmem:[#allocation38_spill] sm:$0xff] %v4685_v48  ;;  %v4737_v48 = vand.u32 4294901760, %v4708_v21  ;;  %3600 = vmatprep.subr.mxu1 %v4732_v14  ;;  %3577 = vmatprep.subr.mxu0 %v4692_v20 }
  0x19   :  { %6205 = vst [vmem:[#allocation39_spill] sm:$0xff] %v4689_v54  ;;  %6206 = vst [vmem:[#allocation40_spill] sm:$0xff] %v4692_v20  ;;  %3601 = vmatpush3.msra.mxu1 %v4749_v63  ;;  %3578 = vmatpush3.msra.mxu0 %v4711_v57 }
  0x1a   :  { %6207 = vst [vmem:[#allocation41_spill] sm:$0xff] %v4704_v62  ;;  %6208 = vst [vmem:[#allocation42_spill] sm:$0xff] %v4708_v21  ;;  %v212_v62 = vsub.f32 %v4689_v54, %v4720_v52  ;;  %3602 = vmatprep.subr.mxu1 %v4767_v6  ;;  %3579 = vmatprep.subr.mxu0 %v4740_v38 }
  0x1b   :  { %6209 = vst [vmem:[#allocation43_spill] sm:$0xff] %v4711_v57  ;;  %6210 = vst [vmem:[#allocation44_spill] sm:$0xff] %v4715_v53  ;;  %v331_v53 = vsub.f32 %v4708_v21, %v4737_v48 }
  0x1c   :  { %6211 = vst [vmem:[#allocation45_spill] sm:$0xff] %v4720_v52  ;;  %6212 = vst [vmem:[#allocation46_spill] sm:$0xff] %v4724_v47  ;;  %v4772_v52 = vand.u32 4294901760, %v4729_v26  ;;  %v4785_v43 = vand.u32 4294901760, %v212_v62 }
  0x1d   :  { %6213 = vst [vmem:[#allocation47_spill] sm:$0xff] %v4732_v14  ;;  %6214 = vst [vmem:[#allocation48_spill] sm:$0xff] %v4737_v48  ;;  %v219_v14 = vsub.f32 %v4724_v47, %v4754_v7  ;;  %v4790_v48 = vand.u32 4294901760, %v4758_v55  ;;  %v4802_v62 = vand.u32 4294901760, %v331_v53 }
  0x1e   :  { %6215 = vst [vmem:[#allocation49_spill] sm:$0xff] %v4740_v38  ;;  %6216 = vst [vmem:[#allocation50_spill] sm:$0xff] %v4749_v63  ;;  %v4805_v63 = vand.u32 4294901760, %v4776_v28  ;;  %3603 = vmatpush3.msra.mxu1 %v4785_v43  ;;  %3580 = vmatpush3.msra.mxu0 %v4772_v52 }
  0x1f   :  { %6217 = vst [vmem:[#allocation51_spill] sm:$0xff] %v4754_v7  ;;  %6218 = vst [vmem:[#allocation52_spill] sm:$0xff] %v4758_v55  ;;  %v4809_v7 = vsub.f32 %v4580_v46, %v4623_v60  ;;  %v4821_v53 = vand.u32 4294901760, %v219_v14  ;;  %v4827_v46 = vsub.f32 %v4596_v51, %v4640_v1  ;;  %3604 = vmatprep.subr.mxu1 %v4802_v62  ;;  %v4844_v51 = vand.u32 4294901760, %v4798_v39  ;;  %v4849_v1 = vld [vmem:[%s5947_s1 + $0x8] sm:$0xff]  ;;  %v4868_v60 = vld [vmem:[%s5947_s1 + $0x80] sm:$0xff] }
  0x20   :  { %6219 = vst [vmem:[#allocation53_spill] sm:$0xff] %v4767_v6  ;;  %6220 = vst [vmem:[#allocation54_spill] sm:$0xff] %v4772_v52  ;;  %v338_v6 = vsub.f32 %v4758_v55, %v4790_v48  ;;  %3581 = vmatprep.subr.mxu0 %v4793_v37  ;;  %v4890_v41 = vand.u32 4294901760, %v4849_v1 }
  0x21   :  { %6221 = vst [vmem:[#allocation55_spill] sm:$0xff] %v4776_v28  ;;  %6222 = vst [vmem:[#allocation56_spill] sm:$0xff] %v4785_v43  ;;  %v226_v43 = vsub.f32 %v4776_v28, %v4805_v63  ;;  %v4837_v14 = vand.u32 4294901760, %v4809_v7  ;;  %3605 = vmatpush3.msra.mxu1 %v4821_v53  ;;  %3582 = vmatpush3.msra.mxu0 %v4812_v34 }
  0x22   :  { %6223 = vst [vmem:[#allocation57_spill] sm:$0xff] %v4790_v48  ;;  %6224 = vst [vmem:[#allocation58_spill] sm:$0xff] %v4793_v37  ;;  %v4841_v48 = vsub.f32 %v4611_v56, %v4659_v12  ;;  %v4860_v56 = vsub.f32 %v4628_v61, %v4678_v42  ;;  %v4863_v12 = vand.u32 4294901760, %v4817_v33  ;;  %v4880_v61 = vsub.f32 %v4645_v2, %v4692_v20  ;;  %v4899_v2 = vld [vmem:[%s5947_s1] sm:$0xff] }
  0x23   :  { %6225 = vst [vmem:[#allocation59_spill] sm:$0xff] %v4802_v62  ;;  %6226 = vst [vmem:[#allocation60_spill] sm:$0xff] %v4805_v63  ;;  %v4853_v62 = vand.u32 4294901760, %v338_v6  ;;  %v4856_v63 = vand.u32 4294901760, %v4827_v46  ;;  %v345_v6 = vsub.f32 %v4809_v7, %v4837_v14  ;;  %3583 = vmatprep.subr.mxu0 %v4830_v29  ;;  %v4937_v30 = vand.u32 4294901760, %v4899_v2 }
  0x24   :  { %6227 = vst [vmem:[#allocation61_spill] sm:$0xff] %v4809_v7  ;;  %6228 = vst [vmem:[#allocation62_spill] sm:$0xff] %v4821_v53  ;;  %v4871_v53 = vand.u32 4294901760, %v226_v43  ;;  %v4876_v50 = vand.u32 4294901760, %v4841_v48  ;;  %v4887_v43 = vand.u32 4294901760, %v4860_v56  ;;  %v4908_v20 = vand.u32 4294901760, %v4880_v61  ;;  %3584 = vmatpush3.msra.mxu0 %v4844_v51 }
  0x25   :  { %6229 = vst [vmem:[#allocation63_spill] sm:$0xff] %v4827_v46  ;;  %6230 = vst [vmem:[#allocation64_spill] sm:$0xff] %v4837_v14  ;;  %3606 = vmatprep.subr.mxu1 %v4853_v62  ;;  %v233_v42 = vsub.f32 %v4827_v46, %v4856_v63  ;;  %v4894_v14 = vsub.f32 %v4664_v13, %v4711_v57  ;;  %v4911_v13 = vand.u32 4294901760, %v4868_v60  ;;  %v4916_v57 = vld [vmem:[%s5948_s0 + $0x8] sm:$0xff]  ;;  %3585 = vmatprep.subr.mxu0 %v4863_v12 }
  0x26   :  { %6231 = vst [vmem:[#allocation65_spill] sm:$0xff] %v4841_v48  ;;  %6232 = vst [vmem:[#allocation66_spill] sm:$0xff] %v4853_v62  ;;  %3607 = vmatpush3.msra.mxu1 %v4871_v53  ;;  %v4902_v62 = vand.u32 4294901760, %v345_v6  ;;  %v240_v6 = vsub.f32 %v4860_v56, %v4887_v43  ;;  %3586 = vmatpush3.msra.mxu0 %v4890_v41 }
  0x27   :  { %6233 = vst [vmem:[#allocation67_spill] sm:$0xff] %v4856_v63  ;;  %6234 = vst [vmem:[#allocation68_spill] sm:$0xff] %v4860_v56  ;;  %v352_v63 = vsub.f32 %v4841_v48, %v4876_v50  ;;  %v4918_v36 = vand.u32 4294901760, %v233_v42  ;;  %v359_v42 = vsub.f32 %v4880_v61, %v4908_v20  ;;  %3587 = vmatprep.subr.mxu0 %v4911_v13 }
  0x28   :  { %6235 = vst [vmem:[#allocation69_spill] sm:$0xff] %v4863_v12  ;;  %6236 = vst [vmem:[#allocation70_spill] sm:$0xff] %v4871_v53  ;;  %v4924_v53 = vand.u32 4294901760, %v4894_v14  ;;  %3608 = vmatprep.subr.mxu1 %v4902_v62  ;;  %3588 = vmatpush3.msra.mxu0 %v4937_v30 }
  0x29   :  { %6237 = vst [vmem:[#allocation71_spill] sm:$0xff] %v4876_v50  ;;  %6238 = vst [vmem:[#allocation72_spill] sm:$0xff] %v4880_v61  ;;  %v4928_v50 = vsub.f32 %v4697_v58, %v4740_v38  ;;  %v4931_v32 = vand.u32 4294901760, %v352_v63  ;;  %v4946_v58 = vld [vmem:[%s5948_s0] sm:$0xff]  ;;  %3609 = vmatpush3.msra.mxu1 %v4918_v36  ;;  %v4949_v63 = vand.u32 4294901760, %v240_v6  ;;  %3627 = vmatprep.subr.mxu0 %v4478_v18 }
  0x2a   :  { %6239 = vst [vmem:[#allocation73_spill] sm:$0xff] %v4887_v43  ;;  %6240 = vst [vmem:[#allocation74_spill] sm:$0xff] %v4890_v41  ;;  %v4941_v43 = vsub.f32 %v4729_v26, %v4772_v52  ;;  %v4958_v26 = vand.u32 4294901760, %v4916_v57  ;;  %v4961_v52 = vand.u32 4294901760, %v359_v42  ;;  %v4982_v38 = vand.u32 4294901760, %v4946_v58 }
  0x2b   :  { %6241 = vst [vmem:[#allocation75_spill] sm:$0xff] %v4894_v14  ;;  %6242 = vst [vmem:[#allocation76_spill] sm:$0xff] %v4902_v62  ;;  %v247_v62 = vsub.f32 %v4894_v14, %v4924_v53  ;;  %3610 = vmatprep.subr.mxu1 %v4931_v32 }
  0x2c   :  { %6243 = vst [vmem:[#allocation77_spill] sm:$0xff] %v4908_v20  ;;  %6244 = vst [vmem:[#allocation78_spill] sm:$0xff] %v4916_v57  ;;  %v4955_v20 = vand.u32 4294901760, %v4928_v50  ;;  %v4965_v6 = vand.u32 4294901760, %v4941_v43  ;;  %3611 = vmatpush3.msra.mxu1 %v4949_v63  ;;  %v4979_v42 = vsub.f32 %v4916_v57, %v4958_v26  ;;  %398 = vmatprep.mubr.f32.mxu1 %v4958_v26 }
  0x2d   :  { %6245 = vst [vmem:[#allocation79_spill] sm:$0xff] %v4918_v36  ;;  %6246 = vst [vmem:[#allocation80_spill] sm:$0xff] %v4924_v53  ;;  %v4969_v36 = vsub.f32 %v4745_v27, %v4793_v37  ;;  %v4972_v53 = vand.u32 4294901760, %v247_v62  ;;  %3612 = vmatprep.subr.mxu1 %v4961_v52 }
  0x2e   :  { %6247 = vst [vmem:[#allocation81_spill] sm:$0xff] %v4928_v50  ;;  %6248 = vst [vmem:[#allocation82_spill] sm:$0xff] %v4931_v32  ;;  %v366_v32 = vsub.f32 %v4928_v50, %v4955_v20  ;;  %v254_v27 = vsub.f32 %v4941_v43, %v4965_v6  ;;  %v6079_v57 = vand.u32 4294901760, %v4979_v42 }
  0x2f   :  { %6249 = vst [vmem:[#allocation83_spill] sm:$0xff] %v4941_v43  ;;  %6250 = vst [vmem:[#allocation84_spill] sm:$0xff] %v4946_v58  ;;  %v4989_v62 = vand.u32 4294901760, %v4969_v36  ;;  %3613 = vmatpush3.msra.mxu1 %v4972_v53 }
  0x30   :  { %6251 = vst [vmem:[#allocation85_spill] sm:$0xff] %v4949_v63  ;;  %6252 = vst [vmem:[#allocation86_spill] sm:$0xff] %v4955_v20  ;;  %v4992_v63 = vand.u32 4294901760, %v366_v32  ;;  %v4998_v20 = vsub.f32 %v4946_v58, %v4982_v38  ;;  %v5010_v32 = vsub.f32 %v4781_v44, %v4830_v29  ;;  %v160_v18 = vsub.f32 %v4979_v42, %v6079_v57 }
  0x31   :  { %6253 = vst [vmem:[#allocation87_spill] sm:$0xff] %v4958_v26  ;;  %6254 = vst [vmem:[#allocation88_spill] sm:$0xff] %v4961_v52  ;;  %v5002_v52 = vsub.f32 %v4763_v49, %v4812_v34  ;;  %v373_v37 = vsub.f32 %v4969_v36, %v4989_v62  ;;  %v5037_v57 = vsub.f32 %v4849_v1, %v4890_v41 }
  0x32   :  { %6255 = vst [vmem:[#allocation89_spill] sm:$0xff] %v4965_v6  ;;  %6256 = vst [vmem:[#allocation90_spill] sm:$0xff] %v4969_v36  ;;  %v5004_v6 = vand.u32 4294901760, %v254_v27  ;;  %3614 = vmatprep.subr.mxu1 %v4992_v63  ;;  %v5029_v58 = vand.u32 4294901760, %v5010_v32  ;;  %v161_v49 = vand.u32 4294901760, %v160_v18  ;;  %v6269_v26 = vand.u32 4294901760, %v4998_v20 }
  0x33   :  { %6257 = vst [vmem:[#allocation91_spill] sm:$0xff] %v4972_v53  ;;  %6258 = vst [vmem:[#allocation92_spill] sm:$0xff] %v4989_v62  ;;  %v5019_v27 = vand.u32 4294901760, %v5002_v52  ;;  %v5023_v53 = vsub.f32 %v4798_v39, %v4844_v51  ;;  %v5026_v44 = vand.u32 4294901760, %v373_v37  ;;  %v5054_v18 = vand.u32 4294901760, %v5037_v57 }
  0x34   :  { %6259 = vst [vmem:[#allocation93_spill] sm:$0xff] %v4992_v63  ;;  %6260 = vst [vmem:[#allocation94_spill] sm:$0xff] %v5002_v52  ;;  %3615 = vmatpush3.msra.mxu1 %v5004_v6  ;;  %v5033_v63 = vsub.f32 %v4817_v33, %v4863_v12  ;;  %v166_v39 = vsub.f32 %v4998_v20, %v6269_v26  ;;  %v380_v33 = vsub.f32 %v5010_v32, %v5029_v58 }
  0x35   :  { %6261 = vst [vmem:[#allocation95_spill] sm:$0xff] %v5004_v6  ;;  %6262 = vst [vmem:[#allocation96_spill] sm:$0xff] %v5010_v32  ;;  %v261_v37 = vsub.f32 %v5002_v52, %v5019_v27  ;;  %v5045_v6 = vand.u32 4294901760, %v5023_v53  ;;  %3616 = vmatprep.subr.mxu1 %v5026_v44  ;;  %v5058_v1 = vsub.f32 %v4868_v60, %v4911_v13  ;;  %162 = vmatprep.mubr.f32.mxu0 %v161_v49 }
  0x36   :  { %6263 = vst [vmem:[#allocation97_spill] sm:$0xff] %v5019_v27  ;;  %6264 = vst [vmem:[#allocation98_spill] sm:$0xff] %v5023_v53  ;;  %v5051_v62 = vand.u32 4294901760, %v5033_v63  ;;  %v167_v26 = vand.u32 4294901760, %v166_v39  ;;  %v5068_v41 = vand.u32 4294901760, %v380_v33  ;;  %v275_v60 = vsub.f32 %v5037_v57, %v5054_v18 }
  0x37   :  { %6265 = vst [vmem:[#allocation99_spill] sm:$0xff] %v5026_v44  ;;  %6266 = vst [vmem:[#allocation100_spill] sm:$0xff] %v5029_v58  ;;  %v5060_v27 = vand.u32 4294901760, %v261_v37  ;;  %v268_v44 = vsub.f32 %v5023_v53, %v5045_v6  ;;  %v5066_v58 = vsub.f32 %v4899_v2, %v4937_v30  ;;  %v5075_v49 = vand.u32 4294901760, %v5058_v1 }
  0x38   :  { %6267 = vst [vmem:[#allocation101_spill] sm:$0xff] %v5033_v63  ;;  %6268 = vst [vmem:[#allocation102_spill] sm:$0xff] %v5037_v57  ;;  %v387_v12 = vsub.f32 %v5033_v63, %v5051_v62  ;;  %168 = vmatmul.mubr.f32.vlgmr.msra.gmra.mxu0 %v167_v26  ;;  %v5087_v33 = vand.u32 4294901760, %v275_v60  ;;  %v6283_v60 = vld [vmem:[#allocation8_spill] sm:$0xff] }
  0x39   :  { %6270 = vst [vmem:[#allocation103_spill] sm:$0xff] %v5045_v6  ;;  %6271 = vst [vmem:[#allocation104_spill] sm:$0xff] %v5051_v62  ;;  %3617 = vmatpush3.msra.mxu1 %v5060_v27  ;;  %v5078_v39 = vand.u32 4294901760, %v268_v44  ;;  %v5081_v37 = vand.u32 4294901760, %v5066_v58  ;;  %3628 = vmatpush3.msra.mxu0 %v4500_v23 }
  0x3a   :  { %6272 = vst [vmem:[#allocation105_spill] sm:$0xff] %v5054_v18  ;;  %6273 = vst [vmem:[#allocation106_spill] sm:$0xff] %v5058_v1  ;;  %3618 = vmatprep.subr.mxu1 %v5068_v41  ;;  %v5085_v2 = vand.u32 4294901760, %v387_v12  ;;  %v394_v18 = vsub.f32 %v5058_v1, %v5075_v49  ;;  %3629 = vmatprep.subr.mxu0 %v4506_v25 }
  0x3b   :  { %6274 = vst [vmem:[#allocation107_spill] sm:$0xff] %v5066_v58  ;;  %6275 = vst [vmem:[#allocation108_spill] sm:$0xff] %v5075_v49  ;;  %3619 = vmatpush3.msra.mxu1 %v5078_v39  ;;  %v282_v44 = vsub.f32 %v5066_v58, %v5081_v37  ;;  %3630 = vmatpush3.msra.mxu0 %v4531_v31 }
  0x3c   :  { %6276 = vst [vmem:[#allocation109_spill] sm:$0xff] %v5078_v39  ;;  %6277 = vst [vmem:[#allocation110_spill] sm:$0xff] %v5081_v37  ;;  %3620 = vmatprep.subr.mxu1 %v5085_v2  ;;  %v5097_v26 = vand.u32 4294901760, %v394_v18  ;;  %3631 = vmatprep.subr.mxu0 %v4544_v35  ;;  %v6282_v18 = vld [vmem:[#allocation6_spill] sm:$0xff] }
  0x3d   :  { %6278 = vst [vmem:[#allocation111_spill] sm:$0xff] %v5085_v2  ;;  %6279 = vst [vmem:[#allocation112_spill] sm:$0xff] %v5087_v33  ;;  %3621 = vmatpush3.msra.mxu1 %v5087_v33  ;;  %v5101_v12 = vand.u32 4294901760, %v282_v44  ;;  %3632 = vmatpush3.msra.mxu0 %v4561_v40  ;;  %v6284_v44 = vld [vmem:[#allocation12_spill] sm:$0xff] }
  0x3e   :  { %6280 = vst [vmem:[#allocation113_spill] sm:$0xff] %v5097_v26  ;;  %3622 = vmatprep.subr.mxu1 %v5097_v26  ;;  %3633 = vmatprep.subr.mxu0 %v4575_v45 }
  0x3f   :  { %6281 = vst [vmem:[#allocation114_spill] sm:$0xff] %v5101_v12  ;;  %3623 = vmatpush3.msra.mxu1 %v5101_v12  ;;  %3634 = vmatpush3.msra.mxu0 %v4620_v59 }
  0x40   :  { %400 = vmatmul.mubr.f32.vlgmr.msra.gmra.mxu1 %v4982_v38  ;;  %3635 = vmatprep.subr.mxu0 %v4637_v0 }
  0x41   :  { %3662 = vmatprep.subr.mxu1 %v4440_v3  ;;  %3636 = vmatpush3.msra.mxu0 %v4656_v8 }
  0x42   :  { %3663 = vmatpush3.msra.mxu1 %v4442_v4  ;;  %3637 = vmatprep.subr.mxu0 %v4675_v19 }
  0x43   :  { %3664 = vmatprep.subr.mxu1 %v4444_v5  ;;  %3638 = vmatpush3.msra.mxu0 %v4689_v54 }
  0x44   :  { %3665 = vmatpush3.msra.mxu1 %v4455_v9  ;;  %3639 = vmatprep.subr.mxu0 %v4708_v21  ;;  %v6308_v21 = vld [vmem:[#allocation35_spill] sm:$0xff] }
  0x45   :  { %3666 = vmatprep.subr.mxu1 %v4457_v10  ;;  %3640 = vmatpush3.msra.mxu0 %v4724_v47  ;;  %v6303_v47 = vld [vmem:[#allocation19_spill] sm:$0xff] }
  0x46   :  { %3667 = vmatpush3.msra.mxu1 %v4459_v11  ;;  %3641 = vmatprep.subr.mxu0 %v4758_v55  ;;  %v6302_v55 = vld [vmem:[#allocation74_spill] sm:$0xff] }
  0x47   :  { %3668 = vmatprep.subr.mxu1 %v4471_v15  ;;  %3642 = vmatpush3.msra.mxu0 %v4776_v28  ;;  %v6301_v28 = vld [vmem:[#allocation16_spill] sm:$0xff] }
  0x48   :  { %3669 = vmatpush3.msra.mxu1 %v4473_v16  ;;  %3643 = vmatprep.subr.mxu0 %v4809_v7  ;;  %v6300_v7 = vld [vmem:[#allocation69_spill] sm:$0xff] }
  0x49   :  { %3670 = vmatprep.subr.mxu1 %v4475_v17  ;;  %3644 = vmatpush3.msra.mxu0 %v4827_v46  ;;  %v6285_v46 = vld [vmem:[#allocation15_spill] sm:$0xff] }
  0x4a   :  { %3671 = vmatpush3.msra.mxu1 %v4497_v22  ;;  %3645 = vmatprep.subr.mxu0 %v4841_v48  ;;  %v6286_v48 = vld [vmem:[#allocation20_spill] sm:$0xff] }
  0x4b   :  { %3672 = vmatprep.subr.mxu1 %v4503_v24  ;;  %3646 = vmatpush3.msra.mxu0 %v4860_v56  ;;  %v6287_v56 = vld [vmem:[#allocation26_spill] sm:$0xff] }
  0x4c   :  { %3673 = vmatpush3.msra.mxu1 %v6282_v18  ;;  %3647 = vmatprep.subr.mxu0 %v4880_v61  ;;  %v6288_v61 = vld [vmem:[#allocation29_spill] sm:$0xff] }
  0x4d   :  { %3674 = vmatprep.subr.mxu1 %v6283_v60  ;;  %3648 = vmatpush3.msra.mxu0 %v4894_v14  ;;  %v6289_v14 = vld [vmem:[#allocation33_spill] sm:$0xff] }
  0x4e   :  { %3675 = vmatpush3.msra.mxu1 %v6284_v44  ;;  %3649 = vmatprep.subr.mxu0 %v4928_v50  ;;  %v6290_v50 = vld [vmem:[#allocation37_spill] sm:$0xff] }
  0x4f   :  { %3676 = vmatprep.subr.mxu1 %v6285_v46  ;;  %3650 = vmatpush3.msra.mxu0 %v4941_v43  ;;  %v6291_v43 = vld [vmem:[#allocation40_spill] sm:$0xff] }
  0x50   :  { %3677 = vmatpush3.msra.mxu1 %v6286_v48  ;;  %3651 = vmatprep.subr.mxu0 %v4969_v36  ;;  %v6292_v36 = vld [vmem:[#allocation43_spill] sm:$0xff] }
  0x51   :  { %3678 = vmatprep.subr.mxu1 %v6287_v56  ;;  %3652 = vmatpush3.msra.mxu0 %v5002_v52  ;;  %v6293_v52 = vld [vmem:[#allocation49_spill] sm:$0xff] }
  0x52   :  { %3679 = vmatpush3.msra.mxu1 %v6288_v61  ;;  %3653 = vmatprep.subr.mxu0 %v5010_v32  ;;  %v6294_v32 = vld [vmem:[#allocation54_spill] sm:$0xff] }
  0x53   :  { %3680 = vmatprep.subr.mxu1 %v6289_v14  ;;  %3654 = vmatpush3.msra.mxu0 %v5023_v53  ;;  %v6295_v53 = vld [vmem:[#allocation58_spill] sm:$0xff] }
  0x54   :  { %3681 = vmatpush3.msra.mxu1 %v6290_v50  ;;  %3655 = vmatprep.subr.mxu0 %v5033_v63  ;;  %v6296_v63 = vld [vmem:[#allocation5_spill] sm:$0xff] }
  0x55   :  { %3682 = vmatprep.subr.mxu1 %v6291_v43  ;;  %3656 = vmatpush3.msra.mxu0 %v5037_v57  ;;  %v6297_v57 = vld [vmem:[#allocation9_spill] sm:$0xff] }
  0x56   :  { %3683 = vmatpush3.msra.mxu1 %v6292_v36  ;;  %3657 = vmatprep.subr.mxu0 %v5058_v1  ;;  %v6298_v1 = vld [vmem:[#allocation10_spill] sm:$0xff] }
  0x57   :  { %3684 = vmatprep.subr.mxu1 %v6293_v52  ;;  %3658 = vmatpush3.msra.mxu0 %v5066_v58  ;;  %v6299_v58 = vld [vmem:[#allocation13_spill] sm:$0xff] }
  0x58   :  { %535 = vmatprep.mubr.f32.mxu0 %v4979_v42  ;;  %3685 = vmatpush3.msra.mxu1 %v6294_v32 }
  0x59   :  { %538 = vmatmul.mubr.f32.vlgmr.msra.gmra.mxu0 %v4998_v20  ;;  %3686 = vmatprep.subr.mxu1 %v6295_v53 }
  0x5a   :  { %3697 = vmatprep.subr.mxu0 %v6296_v63  ;;  %3687 = vmatpush3.msra.mxu1 %v4812_v34  ;;  %v6304_v63 = vld [vmem:[#allocation23_spill] sm:$0xff] }
  0x5b   :  { %3698 = vmatpush3.msra.mxu0 %v6297_v57  ;;  %3688 = vmatprep.subr.mxu1 %v4830_v29  ;;  %v6306_v57 = vld [vmem:[#allocation31_spill] sm:$0xff] }
  0x5c   :  { %3699 = vmatprep.subr.mxu0 %v6298_v1  ;;  %3689 = vmatpush3.msra.mxu1 %v4844_v51  ;;  %v6305_v1 = vand.u32 4294901760, %v4979_v42  ;;  %v6312_v42 = vld [vmem:[#allocation48_spill] sm:$0xff] }
  0x5d   :  { %3700 = vmatpush3.msra.mxu0 %v6299_v58  ;;  %3690 = vmatprep.subr.mxu1 %v6300_v7  ;;  %v6307_v58 = vand.u32 4294901760, %v4998_v20  ;;  %v6313_v20 = vld [vmem:[#allocation51_spill] sm:$0xff] }
  0x5e   :  { %3701 = vmatprep.subr.mxu0 %v6301_v28  ;;  %3691 = vmatpush3.msra.mxu1 %v6302_v55  ;;  %v6309_v28 = vld [vmem:[#allocation38_spill] sm:$0xff] }
  0x5f   :  { %3702 = vmatpush3.msra.mxu0 %v6303_v47  ;;  %3692 = vmatprep.subr.mxu1 %v4911_v13  ;;  %v6310_v47 = vld [vmem:[#allocation41_spill] sm:$0xff] }
  0x60   :  { %3703 = vmatprep.subr.mxu0 %v6304_v63  ;;  %3693 = vmatpush3.msra.mxu1 %v4937_v30  ;;  %v6311_v63 = vld [vmem:[#allocation45_spill] sm:$0xff] }
  0x61   :  { %642 = vmatprep.mubr.f32.mxu1 %v6305_v1  ;;  %3704 = vmatpush3.msra.mxu0 %v6306_v57  ;;  %v6315_v1 = vld [vmem:[#allocation60_spill] sm:$0xff] }
  0x62   :  { %646 = vmatmul.mubr.f32.vlgmr.msra.gmra.mxu1 %v6307_v58  ;;  %3705 = vmatprep.subr.mxu0 %v6308_v21  ;;  %v6314_v58 = vld [vmem:[#allocation57_spill] sm:$0xff]  ;;  %v6356_v57 = vld [vmem:[#allocation4_spill] sm:$0xff] }
  0x63   :  { %3732 = vmatprep.subr.mxu1 %v4440_v3  ;;  %3706 = vmatpush3.msra.mxu0 %v6309_v28  ;;  %v6349_v28 = vld [vmem:[#allocation82_spill] sm:$0xff] }
  0x64   :  { %3733 = vmatpush3.msra.mxu1 %v4442_v4  ;;  %3707 = vmatprep.subr.mxu0 %v6310_v47  ;;  %v6316_v47 = vld [vmem:[#allocation64_spill] sm:$0xff] }
  0x65   :  { %3734 = vmatprep.subr.mxu1 %v4444_v5  ;;  %3708 = vmatpush3.msra.mxu0 %v6311_v63  ;;  %v6317_v63 = vld [vmem:[#allocation67_spill] sm:$0xff] }
  0x66   :  { %3735 = vmatpush3.msra.mxu1 %v4455_v9  ;;  %3709 = vmatprep.subr.mxu0 %v6312_v42  ;;  %v6318_v42 = vld [vmem:[#allocation71_spill] sm:$0xff] }
  0x67   :  { %3736 = vmatprep.subr.mxu1 %v4457_v10  ;;  %3710 = vmatpush3.msra.mxu0 %v6313_v20  ;;  %v6319_v20 = vld [vmem:[#allocation73_spill] sm:$0xff] }
  0x68   :  { %3737 = vmatpush3.msra.mxu1 %v4459_v11  ;;  %3711 = vmatprep.subr.mxu0 %v6314_v58  ;;  %v6320_v58 = vld [vmem:[#allocation77_spill] sm:$0xff] }
  0x69   :  { %3738 = vmatprep.subr.mxu1 %v4471_v15  ;;  %3712 = vmatpush3.msra.mxu0 %v6315_v1  ;;  %v6321_v1 = vld [vmem:[#allocation80_spill] sm:$0xff] }
  0x6a   :  { %3739 = vmatpush3.msra.mxu1 %v4473_v16  ;;  %3713 = vmatprep.subr.mxu0 %v6316_v47  ;;  %v6322_v47 = vld [vmem:[#allocation86_spill] sm:$0xff] }
  0x6b   :  { %3740 = vmatprep.subr.mxu1 %v4475_v17  ;;  %3714 = vmatpush3.msra.mxu0 %v6317_v63  ;;  %v6323_v63 = vld [vmem:[#allocation89_spill] sm:$0xff] }
  0x6c   :  { %3741 = vmatpush3.msra.mxu1 %v4497_v22  ;;  %3715 = vmatprep.subr.mxu0 %v6318_v42  ;;  %v6324_v42 = vld [vmem:[#allocation92_spill] sm:$0xff] }
  0x6d   :  { %3742 = vmatprep.subr.mxu1 %v4503_v24  ;;  %3716 = vmatpush3.msra.mxu0 %v6319_v20  ;;  %v6325_v20 = vld [vmem:[#allocation97_spill] sm:$0xff] }
  0x6e   :  { %3743 = vmatpush3.msra.mxu1 %v6282_v18  ;;  %3717 = vmatprep.subr.mxu0 %v6320_v58  ;;  %v6326_v58 = vld [vmem:[#allocation100_spill] sm:$0xff] }
  0x6f   :  { %3744 = vmatprep.subr.mxu1 %v6283_v60  ;;  %3718 = vmatpush3.msra.mxu0 %v6321_v1  ;;  %v6345_v1 = vld [vmem:[#allocation66_spill] sm:$0xff] }
  0x70   :  { %3745 = vmatpush3.msra.mxu1 %v6284_v44  ;;  %3719 = vmatprep.subr.mxu0 %v6322_v47  ;;  %v6340_v47 = vld [vmem:[#allocation50_spill] sm:$0xff] }
  0x71   :  { %3746 = vmatprep.subr.mxu1 %v6285_v46  ;;  %3720 = vmatpush3.msra.mxu0 %v6323_v63  ;;  %v6327_v63 = vld [vmem:[#allocation105_spill] sm:$0xff] }
  0x72   :  { %3747 = vmatpush3.msra.mxu1 %v6286_v48  ;;  %3721 = vmatprep.subr.mxu0 %v6324_v42 }
  0x73   :  { %3748 = vmatprep.subr.mxu1 %v6287_v56  ;;  %3722 = vmatpush3.msra.mxu0 %v6325_v20  ;;  %v6332_v20 = vld [vmem:[#allocation21_spill] sm:$0xff] }
  0x74   :  { %3749 = vmatpush3.msra.mxu1 %v6288_v61  ;;  %3723 = vmatprep.subr.mxu0 %v6326_v58  ;;  %v6328_v58 = vld [vmem:[#allocation87_spill] sm:$0xff] }
  0x75   :  { %3750 = vmatprep.subr.mxu1 %v6289_v14  ;;  %3724 = vmatpush3.msra.mxu0 %v5045_v6 }
  0x76   :  { %3751 = vmatpush3.msra.mxu1 %v6290_v50  ;;  %3725 = vmatprep.subr.mxu0 %v5051_v62  ;;  %v6331_v62 = vld [vmem:[#allocation84_spill] sm:$0xff] }
  0x77   :  { %3752 = vmatprep.subr.mxu1 %v6291_v43  ;;  %3726 = vmatpush3.msra.mxu0 %v6327_v63  ;;  %v6330_v63 = vld [vmem:[#allocation18_spill] sm:$0xff]  ;;  %v927_v6 = vmul.f32 %v6331_v62, %v6331_v62 }
  0x78   :  { %3753 = vmatpush3.msra.mxu1 %v6292_v36  ;;  %3727 = vmatprep.subr.mxu0 %v5075_v49  ;;  %v6336_v62 = vld [vmem:[#allocation30_spill] sm:$0xff] }
  0x79   :  { %3754 = vmatprep.subr.mxu1 %v6293_v52  ;;  %3728 = vmatpush3.msra.mxu0 %v5081_v37  ;;  %v6329_v37 = vld [vmem:[#allocation78_spill] sm:$0xff]  ;;  %v5263_v42 = vand.u32 4294901760, %v927_v6 }
  0x7a   :  { %812 = vmatprep.mubr.f32.mxu0 %v6328_v58  ;;  %3755 = vmatpush3.msra.mxu1 %v6294_v32  ;;  %v928_v49 = vmul.f32 %v6329_v37, %v6329_v37 }
  0x7b   :  { %814 = vmatmul.mubr.f32.vlgmr.msra.gmra.mxu0 %v4982_v38  ;;  %3756 = vmatprep.subr.mxu1 %v6295_v53 }
  0x7c   :  { %3767 = vmatprep.subr.mxu0 %v4440_v3  ;;  %3757 = vmatpush3.msra.mxu1 %v4812_v34  ;;  %v5259_v37 = vand.u32 4294901760, %v928_v49 }
  0x7d   :  { %3768 = vmatpush3.msra.mxu0 %v4442_v4  ;;  %3758 = vmatprep.subr.mxu1 %v4830_v29 }
  0x7e   :  { %3769 = vmatprep.subr.mxu0 %v4444_v5  ;;  %3759 = vmatpush3.msra.mxu1 %v4844_v51 }
  0x7f   :  { %3770 = vmatpush3.msra.mxu0 %v4455_v9  ;;  %3760 = vmatprep.subr.mxu1 %v6300_v7 }
  0x80   :  { %3771 = vmatprep.subr.mxu0 %v4457_v10  ;;  %3761 = vmatpush3.msra.mxu1 %v6302_v55 }
  0x81   :  { %3772 = vmatpush3.msra.mxu0 %v4459_v11  ;;  %3762 = vmatprep.subr.mxu1 %v4911_v13 }
  0x82   :  { %3773 = vmatprep.subr.mxu0 %v4471_v15  ;;  %3763 = vmatpush3.msra.mxu1 %v4937_v30 }
  0x83   :  { %916 = vmatprep.mubr.f32.mxu1 %v6328_v58  ;;  %3774 = vmatpush3.msra.mxu0 %v4473_v16  ;;  %v6333_v58 = vld [vmem:[#allocation22_spill] sm:$0xff] }
  0x84   :  { %918 = vmatmul.mubr.f32.vlgmr.msra.gmra.mxu1 %v4982_v38  ;;  %3775 = vmatprep.subr.mxu0 %v4475_v17  ;;  %v6334_v38 = vld [vmem:[#allocation24_spill] sm:$0xff] }
  0x85   :  { %3802 = vmatprep.subr.mxu1 %v6330_v63  ;;  %3776 = vmatpush3.msra.mxu0 %v4497_v22  ;;  %v6335_v63 = vld [vmem:[#allocation27_spill] sm:$0xff] }
  0x86   :  { %3803 = vmatpush3.msra.mxu1 %v6332_v20  ;;  %3777 = vmatprep.subr.mxu0 %v4503_v24  ;;  %v6337_v20 = vld [vmem:[#allocation34_spill] sm:$0xff] }
  0x87   :  { %3804 = vmatprep.subr.mxu1 %v6333_v58  ;;  %3778 = vmatpush3.msra.mxu0 %v6282_v18  ;;  %v6338_v58 = vld [vmem:[#allocation44_spill] sm:$0xff] }
  0x88   :  { %3805 = vmatpush3.msra.mxu1 %v6334_v38  ;;  %3779 = vmatprep.subr.mxu0 %v6283_v60  ;;  %v6339_v38 = vld [vmem:[#allocation47_spill] sm:$0xff] }
  0x89   :  { %3806 = vmatprep.subr.mxu1 %v6335_v63  ;;  %3780 = vmatpush3.msra.mxu0 %v6284_v44  ;;  %v5274_v63 = vsub.f32 %v928_v49, %v5259_v37 }
  0x8a   :  { %3807 = vmatpush3.msra.mxu1 %v6336_v62  ;;  %3781 = vmatprep.subr.mxu0 %v6285_v46  ;;  %v5279_v62 = vsub.f32 %v927_v6, %v5263_v42 }
  0x8b   :  { %3808 = vmatprep.subr.mxu1 %v6337_v20  ;;  %3782 = vmatpush3.msra.mxu0 %v6286_v48  ;;  %v6341_v20 = vld [vmem:[#allocation53_spill] sm:$0xff]  ;;  %v6146_v49 = vand.u32 4294901760, %v5274_v63 }
  0x8c   :  { %3809 = vmatpush3.msra.mxu1 %v6338_v58  ;;  %3783 = vmatprep.subr.mxu0 %v6287_v56  ;;  %v6342_v58 = vld [vmem:[#allocation56_spill] sm:$0xff]  ;;  %v6147_v6 = vand.u32 4294901760, %v5279_v62 }
  0x8d   :  { %3810 = vmatprep.subr.mxu1 %v6339_v38  ;;  %3784 = vmatpush3.msra.mxu0 %v6288_v61  ;;  %v6343_v38 = vld [vmem:[#allocation59_spill] sm:$0xff] }
  0x8e   :  { %3811 = vmatpush3.msra.mxu1 %v6340_v47  ;;  %3785 = vmatprep.subr.mxu0 %v6289_v14  ;;  %v6344_v47 = vld [vmem:[#allocation62_spill] sm:$0xff] }
  0x8f   :  { %3812 = vmatprep.subr.mxu1 %v6341_v20  ;;  %3786 = vmatpush3.msra.mxu0 %v6290_v50  ;;  %v6346_v20 = vld [vmem:[#allocation70_spill] sm:$0xff] }
  0x90   :  { %3813 = vmatpush3.msra.mxu1 %v6342_v58  ;;  %3787 = vmatprep.subr.mxu0 %v6291_v43  ;;  %v6347_v58 = vld [vmem:[#allocation76_spill] sm:$0xff] }
  0x91   :  { %3814 = vmatprep.subr.mxu1 %v6343_v38  ;;  %3788 = vmatpush3.msra.mxu0 %v6292_v36  ;;  %v1028_v38 = vsub.f32 %v5274_v63, %v6146_v49 }
  0x92   :  { %3815 = vmatpush3.msra.mxu1 %v6344_v47  ;;  %3789 = vmatprep.subr.mxu0 %v6293_v52  ;;  %v6348_v47 = vld [vmem:[#allocation79_spill] sm:$0xff] }
  0x93   :  { %3816 = vmatprep.subr.mxu1 %v6345_v1  ;;  %3790 = vmatpush3.msra.mxu0 %v6294_v32  ;;  %v1034_v1 = vsub.f32 %v5279_v62, %v6147_v6  ;;  %v1029_v49 = vand.u32 4294901760, %v1028_v38  ;;  %v6353_v6 = vld [vmem:[#allocation93_spill] sm:$0xff]  ;;  %v6359_v38 = vld [vmem:[#allocation52_spill] sm:$0xff] }
  0x94   :  { %3817 = vmatpush3.msra.mxu1 %v6346_v20  ;;  %3791 = vmatprep.subr.mxu0 %v6295_v53  ;;  %v6350_v20 = vld [vmem:[#allocation85_spill] sm:$0xff] }
  0x95   :  { %3818 = vmatprep.subr.mxu1 %v6347_v58  ;;  %3792 = vmatpush3.msra.mxu0 %v4812_v34  ;;  %v6351_v58 = vld [vmem:[#allocation88_spill] sm:$0xff]  ;;  %v1035_v21 = vand.u32 4294901760, %v1034_v1  ;;  %v6358_v1 = vld [vmem:[#allocation46_spill] sm:$0xff] }
  0x96   :  { %3819 = vmatpush3.msra.mxu1 %v6348_v47  ;;  %3793 = vmatprep.subr.mxu0 %v4830_v29  ;;  %v6352_v47 = vld [vmem:[#allocation91_spill] sm:$0xff] }
  0x97   :  { %3820 = vmatprep.subr.mxu1 %v6349_v28  ;;  %3794 = vmatpush3.msra.mxu0 %v4844_v51  ;;  %v6354_v28 = vld [vmem:[#allocation95_spill] sm:$0xff] }
  0x98   :  { %3821 = vmatpush3.msra.mxu1 %v6350_v20  ;;  %3795 = vmatprep.subr.mxu0 %v6300_v7  ;;  %v6355_v20 = vld [vmem:[#allocation99_spill] sm:$0xff] }
  0x99   :  { %3822 = vmatprep.subr.mxu1 %v6351_v58  ;;  %3796 = vmatpush3.msra.mxu0 %v6302_v55 }
  0x9a   :  { %3823 = vmatpush3.msra.mxu1 %v6352_v47  ;;  %3797 = vmatprep.subr.mxu0 %v4911_v13 }
  0x9b   :  { %3824 = vmatprep.subr.mxu1 %v6353_v6  ;;  %3798 = vmatpush3.msra.mxu0 %v4937_v30 }
  0x9c   :  { %3825 = vmatpush3.msra.mxu1 %v6354_v28  ;;  %1030 = vmatprep.mubr.f32.mxu0 %v1029_v49  ;;  %v6360_v49 = vld [vmem:[#allocation55_spill] sm:$0xff] }
  0x9d   :  { %3826 = vmatprep.subr.mxu1 %v6355_v20  ;;  %3837 = vmatprep.subr.mxu0 %v6356_v57 }
  0x9e   :  { %1036 = vmatmul.mubr.f32.vlgmr.msra.gmra.mxu0 %v1035_v21  ;;  %3827 = vmatpush3.msra.mxu1 %v5060_v27  ;;  %v6357_v21 = vld [vmem:[#allocation42_spill] sm:$0xff] }
  0x9f   :  { %3838 = vmatpush3.msra.mxu0 %v4500_v23  ;;  %3828 = vmatprep.subr.mxu1 %v5068_v41 }
  0xa0   :  { %3839 = vmatprep.subr.mxu0 %v4506_v25  ;;  %3829 = vmatpush3.msra.mxu1 %v5078_v39 }
  0xa1   :  { %3840 = vmatpush3.msra.mxu0 %v4531_v31  ;;  %3830 = vmatprep.subr.mxu1 %v5085_v2 }
  0xa2   :  { %3841 = vmatprep.subr.mxu0 %v4544_v35  ;;  %3831 = vmatpush3.msra.mxu1 %v5087_v33 }
  0xa3   :  { %3842 = vmatpush3.msra.mxu0 %v4561_v40  ;;  %3832 = vmatprep.subr.mxu1 %v5097_v26 }
  0xa4   :  { %3843 = vmatprep.subr.mxu0 %v4575_v45  ;;  %3833 = vmatpush3.msra.mxu1 %v5101_v12 }
  0xa5   :  { %1266 = vmatprep.mubr.f32.mxu1 %v5259_v37  ;;  %3844 = vmatpush3.msra.mxu0 %v4620_v59 }
  0xa6   :  { %1268 = vmatmul.mubr.f32.vlgmr.msra.gmra.mxu1 %v5263_v42  ;;  %3845 = vmatprep.subr.mxu0 %v4637_v0 }
  0xa7   :  { %3872 = vmatprep.subr.mxu1 %v4440_v3  ;;  %3846 = vmatpush3.msra.mxu0 %v4656_v8  ;;  %v6387_v8 = vld [vmem:[#allocation35_spill] sm:$0xff] }
  0xa8   :  { %3873 = vmatpush3.msra.mxu1 %v4442_v4  ;;  %3847 = vmatprep.subr.mxu0 %v4675_v19  ;;  %v6361_v19 = vld [vmem:[#allocation61_spill] sm:$0xff] }
  0xa9   :  { %3874 = vmatprep.subr.mxu1 %v4444_v5  ;;  %3848 = vmatpush3.msra.mxu0 %v4689_v54  ;;  %v6362_v54 = vld [vmem:[#allocation63_spill] sm:$0xff] }
  0xaa   :  { %3875 = vmatpush3.msra.mxu1 %v4455_v9  ;;  %3849 = vmatprep.subr.mxu0 %v6357_v21  ;;  %v6363_v21 = vld [vmem:[#allocation65_spill] sm:$0xff] }
  0xab   :  { %3876 = vmatprep.subr.mxu1 %v4457_v10  ;;  %3850 = vmatpush3.msra.mxu0 %v6358_v1  ;;  %v6364_v1 = vld [vmem:[#allocation68_spill] sm:$0xff] }
  0xac   :  { %3877 = vmatpush3.msra.mxu1 %v4459_v11  ;;  %3851 = vmatprep.subr.mxu0 %v6359_v38  ;;  %v6365_v38 = vld [vmem:[#allocation72_spill] sm:$0xff] }
  0xad   :  { %3878 = vmatprep.subr.mxu1 %v4471_v15  ;;  %3852 = vmatpush3.msra.mxu0 %v6360_v49  ;;  %v6366_v49 = vld [vmem:[#allocation75_spill] sm:$0xff] }
  0xae   :  { %3879 = vmatpush3.msra.mxu1 %v4473_v16  ;;  %3853 = vmatprep.subr.mxu0 %v6361_v19  ;;  %v6367_v19 = vld [vmem:[#allocation81_spill] sm:$0xff] }
  0xaf   :  { %3880 = vmatprep.subr.mxu1 %v4475_v17  ;;  %3854 = vmatpush3.msra.mxu0 %v6362_v54  ;;  %v6368_v54 = vld [vmem:[#allocation83_spill] sm:$0xff] }
  0xb0   :  { %3881 = vmatpush3.msra.mxu1 %v4497_v22  ;;  %3855 = vmatprep.subr.mxu0 %v6363_v21  ;;  %v6369_v21 = vld [vmem:[#allocation90_spill] sm:$0xff] }
  0xb1   :  { %3882 = vmatprep.subr.mxu1 %v4503_v24  ;;  %3856 = vmatpush3.msra.mxu0 %v6364_v1  ;;  %v6370_v1 = vld [vmem:[#allocation94_spill] sm:$0xff] }
  0xb2   :  { %3883 = vmatpush3.msra.mxu1 %v6282_v18  ;;  %3857 = vmatprep.subr.mxu0 %v6365_v38  ;;  %v6371_v38 = vld [vmem:[#allocation96_spill] sm:$0xff] }
  0xb3   :  { %3884 = vmatprep.subr.mxu1 %v6283_v60  ;;  %3858 = vmatpush3.msra.mxu0 %v6366_v49  ;;  %v6372_v49 = vld [vmem:[#allocation98_spill] sm:$0xff] }
  0xb4   :  { %3885 = vmatpush3.msra.mxu1 %v6284_v44  ;;  %3859 = vmatprep.subr.mxu0 %v6367_v19  ;;  %v6373_v19 = vld [vmem:[#allocation101_spill] sm:$0xff] }
  0xb5   :  { %3886 = vmatprep.subr.mxu1 %v6285_v46  ;;  %3860 = vmatpush3.msra.mxu0 %v6368_v54  ;;  %v6374_v54 = vld [vmem:[#allocation102_spill] sm:$0xff] }
  0xb6   :  { %3887 = vmatpush3.msra.mxu1 %v6286_v48  ;;  %3861 = vmatprep.subr.mxu0 %v6369_v21  ;;  %v6375_v21 = vld [vmem:[#allocation106_spill] sm:$0xff] }
  0xb7   :  { %3888 = vmatprep.subr.mxu1 %v6287_v56  ;;  %3862 = vmatpush3.msra.mxu0 %v6370_v1  ;;  %v6376_v1 = vld [vmem:[#allocation107_spill] sm:$0xff] }
  0xb8   :  { %3889 = vmatpush3.msra.mxu1 %v6288_v61  ;;  %3863 = vmatprep.subr.mxu0 %v6371_v38  ;;  %v6382_v38 = vld [vmem:[#allocation19_spill] sm:$0xff] }
  0xb9   :  { %3890 = vmatprep.subr.mxu1 %v6289_v14  ;;  %3864 = vmatpush3.msra.mxu0 %v6372_v49  ;;  %v6381_v49 = vld [vmem:[#allocation16_spill] sm:$0xff] }
  0xba   :  { %3891 = vmatpush3.msra.mxu1 %v6290_v50  ;;  %3865 = vmatprep.subr.mxu0 %v6373_v19  ;;  %v6377_v19 = vld [vmem:[#allocation5_spill] sm:$0xff] }
  0xbb   :  { %3892 = vmatprep.subr.mxu1 %v6291_v43  ;;  %3866 = vmatpush3.msra.mxu0 %v6374_v54  ;;  %v6378_v54 = vld [vmem:[#allocation9_spill] sm:$0xff] }
  0xbc   :  { %3893 = vmatpush3.msra.mxu1 %v6292_v36  ;;  %3867 = vmatprep.subr.mxu0 %v6375_v21  ;;  %v6379_v21 = vld [vmem:[#allocation10_spill] sm:$0xff] }
  0xbd   :  { %3894 = vmatprep.subr.mxu1 %v6293_v52  ;;  %3868 = vmatpush3.msra.mxu0 %v6376_v1  ;;  %v6380_v1 = vld [vmem:[#allocation13_spill] sm:$0xff] }
  0xbe   :  { %1403 = vmatprep.mubr.f32.mxu0 %v5274_v63  ;;  %3895 = vmatpush3.msra.mxu1 %v6294_v32 }
  0xbf   :  { %1406 = vmatmul.mubr.f32.vlgmr.msra.gmra.mxu0 %v5279_v62  ;;  %3896 = vmatprep.subr.mxu1 %v6295_v53 }
  0xc0   :  { %3907 = vmatprep.subr.mxu0 %v6377_v19  ;;  %3897 = vmatpush3.msra.mxu1 %v4812_v34  ;;  %v6383_v19 = vld [vmem:[#allocation23_spill] sm:$0xff] }
  0xc1   :  { %3908 = vmatpush3.msra.mxu0 %v6378_v54  ;;  %3898 = vmatprep.subr.mxu1 %v4830_v29  ;;  %v6385_v54 = vld [vmem:[#allocation31_spill] sm:$0xff] }
  0xc2   :  { %3909 = vmatprep.subr.mxu0 %v6379_v21  ;;  %3899 = vmatpush3.msra.mxu1 %v4844_v51  ;;  %v6384_v21 = vand.u32 4294901760, %v5274_v63  ;;  %v6391_v63 = vld [vmem:[#allocation48_spill] sm:$0xff] }
  0xc3   :  { %3910 = vmatpush3.msra.mxu0 %v6380_v1  ;;  %3900 = vmatprep.subr.mxu1 %v6300_v7  ;;  %v6386_v1 = vand.u32 4294901760, %v5279_v62  ;;  %v6392_v62 = vld [vmem:[#allocation51_spill] sm:$0xff] }
  0xc4   :  { %3911 = vmatprep.subr.mxu0 %v6381_v49  ;;  %3901 = vmatpush3.msra.mxu1 %v6302_v55  ;;  %v6388_v49 = vld [vmem:[#allocation38_spill] sm:$0xff] }
  0xc5   :  { %3912 = vmatpush3.msra.mxu0 %v6382_v38  ;;  %3902 = vmatprep.subr.mxu1 %v4911_v13  ;;  %v6389_v38 = vld [vmem:[#allocation41_spill] sm:$0xff] }
  0xc6   :  { %3913 = vmatprep.subr.mxu0 %v6383_v19  ;;  %3903 = vmatpush3.msra.mxu1 %v4937_v30  ;;  %v6390_v19 = vld [vmem:[#allocation45_spill] sm:$0xff] }
  0xc7   :  { %1510 = vmatprep.mubr.f32.mxu1 %v6384_v21  ;;  %3914 = vmatpush3.msra.mxu0 %v6385_v54  ;;  %v6393_v21 = vld [vmem:[#allocation57_spill] sm:$0xff]  ;;  %v6427_v54 = vld [vmem:[#allocation66_spill] sm:$0xff] }
  0xc8   :  { %1514 = vmatmul.mubr.f32.vlgmr.msra.gmra.mxu1 %v6386_v1  ;;  %3915 = vmatprep.subr.mxu0 %v6387_v8  ;;  %v6394_v1 = vld [vmem:[#allocation60_spill] sm:$0xff] }
  0xc9   :  { %3942 = vmatprep.subr.mxu1 %v4440_v3  ;;  %3916 = vmatpush3.msra.mxu0 %v6388_v49 }
  0xca   :  { %3943 = vmatpush3.msra.mxu1 %v4442_v4  ;;  %3917 = vmatprep.subr.mxu0 %v6389_v38  ;;  %v6399_v38 = vld [vmem:[#allocation77_spill] sm:$0xff] }
  0xcb   :  { %3944 = vmatprep.subr.mxu1 %v4444_v5  ;;  %3918 = vmatpush3.msra.mxu0 %v6390_v19  ;;  %v4400_v19 = vmov 0.0  }
  0xcc   :  { %3945 = vmatpush3.msra.mxu1 %v4455_v9  ;;  %3919 = vmatprep.subr.mxu0 %v6391_v63  ;;  %24 = vst.msk [vmem:[#allocation2] sm:$0xff] %vm23_vm0, %v4400_v19  ;;  %25 = vst.msk [vmem:[#allocation3] sm:$0xff] %vm23_vm0, %v4400_v19  ;;  %v6395_v63 = vld [vmem:[#allocation64_spill] sm:$0xff] }
  0xcd   :  { %3946 = vmatprep.subr.mxu1 %v4457_v10  ;;  %3920 = vmatpush3.msra.mxu0 %v6392_v62  ;;  %v6396_v62 = vld [vmem:[#allocation67_spill] sm:$0xff]  ;;  %v6400_v19 = vld [vmem:[#allocation80_spill] sm:$0xff] }
  0xce   :  { %3947 = vmatpush3.msra.mxu1 %v4459_v11  ;;  %3921 = vmatprep.subr.mxu0 %v6393_v21  ;;  %v6397_v21 = vld [vmem:[#allocation71_spill] sm:$0xff] }
  0xcf   :  { %3948 = vmatprep.subr.mxu1 %v4471_v15  ;;  %3922 = vmatpush3.msra.mxu0 %v6394_v1  ;;  %v6398_v1 = vld [vmem:[#allocation73_spill] sm:$0xff] }
  0xd0   :  { %3949 = vmatpush3.msra.mxu1 %v4473_v16  ;;  %3923 = vmatprep.subr.mxu0 %v6395_v63  ;;  %v6401_v63 = vld [vmem:[#allocation86_spill] sm:$0xff] }
  0xd1   :  { %3950 = vmatprep.subr.mxu1 %v4475_v17  ;;  %3924 = vmatpush3.msra.mxu0 %v6396_v62  ;;  %v6402_v62 = vld [vmem:[#allocation89_spill] sm:$0xff] }
  0xd2   :  { %3951 = vmatpush3.msra.mxu1 %v4497_v22  ;;  %3925 = vmatprep.subr.mxu0 %v6397_v21  ;;  %v6403_v21 = vld [vmem:[#allocation92_spill] sm:$0xff] }
  0xd3   :  { %3952 = vmatprep.subr.mxu1 %v4503_v24  ;;  %3926 = vmatpush3.msra.mxu0 %v6398_v1  ;;  %v6404_v1 = vld [vmem:[#allocation97_spill] sm:$0xff] }
  0xd4   :  { %3953 = vmatpush3.msra.mxu1 %v6282_v18  ;;  %3927 = vmatprep.subr.mxu0 %v6399_v38  ;;  %v6405_v38 = vld [vmem:[#allocation100_spill] sm:$0xff] }
  0xd5   :  { %3954 = vmatprep.subr.mxu1 %v6283_v60  ;;  %3928 = vmatpush3.msra.mxu0 %v6400_v19  ;;  %v6406_v19 = vld [vmem:[#allocation103_spill] sm:$0xff] }
  0xd6   :  { %3955 = vmatpush3.msra.mxu1 %v6284_v44  ;;  %3929 = vmatprep.subr.mxu0 %v6401_v63  ;;  %v6407_v63 = vld [vmem:[#allocation104_spill] sm:$0xff] }
  0xd7   :  { %3956 = vmatprep.subr.mxu1 %v6285_v46  ;;  %3930 = vmatpush3.msra.mxu0 %v6402_v62  ;;  %v6408_v62 = vld [vmem:[#allocation105_spill] sm:$0xff] }
  0xd8   :  { %3957 = vmatpush3.msra.mxu1 %v6286_v48  ;;  %3931 = vmatprep.subr.mxu0 %v6403_v21  ;;  %v6409_v21 = vld [vmem:[#allocation108_spill] sm:$0xff] }
  0xd9   :  { %3958 = vmatprep.subr.mxu1 %v6287_v56  ;;  %3932 = vmatpush3.msra.mxu0 %v6404_v1  ;;  %v6410_v1 = vld [vmem:[#allocation110_spill] sm:$0xff] }
  0xda   :  { %3959 = vmatpush3.msra.mxu1 %v6288_v61  ;;  %3933 = vmatprep.subr.mxu0 %v6405_v38  ;;  %v6419_v38 = vld [vmem:[#allocation34_spill] sm:$0xff] }
  0xdb   :  { %3960 = vmatprep.subr.mxu1 %v6289_v14  ;;  %3934 = vmatpush3.msra.mxu0 %v6406_v19  ;;  %v6418_v19 = vld [vmem:[#allocation30_spill] sm:$0xff] }
  0xdc   :  { %3961 = vmatpush3.msra.mxu1 %v6290_v50  ;;  %3935 = vmatprep.subr.mxu0 %v6407_v63 }
  0xdd   :  { %3962 = vmatprep.subr.mxu1 %v6291_v43  ;;  %3936 = vmatpush3.msra.mxu0 %v6408_v62  ;;  %v5482_v62 = vld [vmem:[%s5948_s0 + $0x18] sm:$0xff] }
  0xde   :  { %3963 = vmatpush3.msra.mxu1 %v6292_v36  ;;  %3937 = vmatprep.subr.mxu0 %v6409_v21  ;;  %v6412_v21 = vld [vmem:[#allocation21_spill] sm:$0xff]  ;;  %6413 = vst [vmem:[#allocation6_spill] sm:$0xff] %v5482_v62  ;;  %v5496_v63 = vand.u32 4294901760, %v5482_v62 }
  0xdf   :  { %3964 = vmatprep.subr.mxu1 %v6293_v52  ;;  %3938 = vmatpush3.msra.mxu0 %v6410_v1  ;;  %v6411_v1 = vld [vmem:[#allocation18_spill] sm:$0xff] }
  0xe0   :  { %1680 = vmatprep.mubr.f32.mxu0 %v5259_v37  ;;  %3965 = vmatpush3.msra.mxu1 %v6294_v32  ;;  %v5511_v49 = vsub.f32 %v5482_v62, %v5496_v63 }
  0xe1   :  { %1682 = vmatmul.mubr.f32.vlgmr.msra.gmra.mxu0 %v5263_v42  ;;  %3966 = vmatprep.subr.mxu1 %v6295_v53 }
  0xe2   :  { %3977 = vmatprep.subr.mxu0 %v4440_v3  ;;  %3967 = vmatpush3.msra.mxu1 %v4812_v34  ;;  %v6157_v62 = vand.u32 4294901760, %v5511_v49 }
  0xe3   :  { %3978 = vmatpush3.msra.mxu0 %v4442_v4  ;;  %3968 = vmatprep.subr.mxu1 %v4830_v29 }
  0xe4   :  { %3979 = vmatprep.subr.mxu0 %v4444_v5  ;;  %3969 = vmatpush3.msra.mxu1 %v4844_v51 }
  0xe5   :  { %3980 = vmatpush3.msra.mxu0 %v4455_v9  ;;  %3970 = vmatprep.subr.mxu1 %v6300_v7 }
  0xe6   :  { %3981 = vmatprep.subr.mxu0 %v4457_v10  ;;  %3971 = vmatpush3.msra.mxu1 %v6302_v55 }
  0xe7   :  { %3982 = vmatpush3.msra.mxu0 %v4459_v11  ;;  %3972 = vmatprep.subr.mxu1 %v4911_v13 }
  0xe8   :  { %3983 = vmatprep.subr.mxu0 %v4471_v15  ;;  %3973 = vmatpush3.msra.mxu1 %v4937_v30 }
  0xe9   :  { %1784 = vmatprep.mubr.f32.mxu1 %v5259_v37  ;;  %3984 = vmatpush3.msra.mxu0 %v4473_v16  ;;  %v6414_v37 = vld [vmem:[#allocation22_spill] sm:$0xff] }
  0xea   :  { %1786 = vmatmul.mubr.f32.vlgmr.msra.gmra.mxu1 %v5263_v42  ;;  %3985 = vmatprep.subr.mxu0 %v4475_v17  ;;  %v5489_v42 = vld [vmem:[%s5948_s0 + $0x10] sm:$0xff] }
  0xeb   :  { %4012 = vmatprep.subr.mxu1 %v6411_v1  ;;  %3986 = vmatpush3.msra.mxu0 %v4497_v22  ;;  %6415 = vst [vmem:[#allocation8_spill] sm:$0xff] %v5489_v42  ;;  %v6416_v1 = vld [vmem:[#allocation24_spill] sm:$0xff] }
  0xec   :  { %4013 = vmatpush3.msra.mxu1 %v6412_v21  ;;  %3987 = vmatprep.subr.mxu0 %v4503_v24  ;;  %v6417_v21 = vld [vmem:[#allocation27_spill] sm:$0xff] }
  0xed   :  { %4014 = vmatprep.subr.mxu1 %v6414_v37  ;;  %3988 = vmatpush3.msra.mxu0 %v6282_v18  ;;  %v5501_v37 = vand.u32 4294901760, %v5489_v42 }
  0xee   :  { %4015 = vmatpush3.msra.mxu1 %v6416_v1  ;;  %3989 = vmatprep.subr.mxu0 %v6283_v60  ;;  %v6420_v1 = vld [vmem:[#allocation44_spill] sm:$0xff] }
  0xef   :  { %4016 = vmatprep.subr.mxu1 %v6417_v21  ;;  %3990 = vmatpush3.msra.mxu0 %v6284_v44  ;;  %v6421_v21 = vld [vmem:[#allocation47_spill] sm:$0xff]  ;;  %v5517_v8 = vsub.f32 %v5489_v42, %v5501_v37 }
  0xf0   :  { %4017 = vmatpush3.msra.mxu1 %v6418_v19  ;;  %3991 = vmatprep.subr.mxu0 %v6285_v46  ;;  %v6422_v19 = vld [vmem:[#allocation50_spill] sm:$0xff] }
  0xf1   :  { %4018 = vmatprep.subr.mxu1 %v6419_v38  ;;  %3992 = vmatpush3.msra.mxu0 %v6286_v48  ;;  %v6423_v38 = vld [vmem:[#allocation53_spill] sm:$0xff]  ;;  %v6158_v42 = vand.u32 4294901760, %v5517_v8 }
  0xf2   :  { %4019 = vmatpush3.msra.mxu1 %v6420_v1  ;;  %3993 = vmatprep.subr.mxu0 %v6287_v56  ;;  %v6424_v1 = vld [vmem:[#allocation56_spill] sm:$0xff] }
  0xf3   :  { %4020 = vmatprep.subr.mxu1 %v6421_v21  ;;  %3994 = vmatpush3.msra.mxu0 %v6288_v61  ;;  %v6425_v21 = vld [vmem:[#allocation59_spill] sm:$0xff] }
  0xf4   :  { %4021 = vmatpush3.msra.mxu1 %v6422_v19  ;;  %3995 = vmatprep.subr.mxu0 %v6289_v14  ;;  %v6426_v19 = vld [vmem:[#allocation62_spill] sm:$0xff] }
  0xf5   :  { %4022 = vmatprep.subr.mxu1 %v6423_v38  ;;  %3996 = vmatpush3.msra.mxu0 %v6290_v50  ;;  %v6428_v38 = vld [vmem:[#allocation70_spill] sm:$0xff] }
  0xf6   :  { %4023 = vmatpush3.msra.mxu1 %v6424_v1  ;;  %3997 = vmatprep.subr.mxu0 %v6291_v43  ;;  %v6429_v1 = vld [vmem:[#allocation76_spill] sm:$0xff] }
  0xf7   :  { %4024 = vmatprep.subr.mxu1 %v6425_v21  ;;  %3998 = vmatpush3.msra.mxu0 %v6292_v36  ;;  %v1896_v21 = vsub.f32 %v5511_v49, %v6157_v62 }
  0xf8   :  { %4025 = vmatpush3.msra.mxu1 %v6426_v19  ;;  %3999 = vmatprep.subr.mxu0 %v6293_v52  ;;  %v6430_v19 = vld [vmem:[#allocation79_spill] sm:$0xff] }
  0xf9   :  { %4026 = vmatprep.subr.mxu1 %v6427_v54  ;;  %4000 = vmatpush3.msra.mxu0 %v6294_v32  ;;  %v1902_v54 = vsub.f32 %v5517_v8, %v6158_v42  ;;  %v6431_v32 = vld [vmem:[#allocation82_spill] sm:$0xff]  ;;  %v1897_v62 = vand.u32 4294901760, %v1896_v21  ;;  %v6435_v21 = vld [vmem:[#allocation39_spill] sm:$0xff] }
  0xfa   :  { %4027 = vmatpush3.msra.mxu1 %v6428_v38  ;;  %4001 = vmatprep.subr.mxu0 %v6295_v53  ;;  %v6432_v38 = vld [vmem:[#allocation85_spill] sm:$0xff]  ;;  %v6437_v42 = vld [vmem:[#allocation46_spill] sm:$0xff] }
  0xfb   :  { %4028 = vmatprep.subr.mxu1 %v6429_v1  ;;  %4002 = vmatpush3.msra.mxu0 %v4812_v34 }
  0xfc   :  { %4029 = vmatpush3.msra.mxu1 %v6430_v19  ;;  %4003 = vmatprep.subr.mxu0 %v4830_v29  ;;  %v1903_v19 = vand.u32 4294901760, %v1902_v54  ;;  %v6433_v54 = vld [vmem:[#allocation32_spill] sm:$0xff] }
  0xfd   :  { %4030 = vmatprep.subr.mxu1 %v6431_v32  ;;  %4004 = vmatpush3.msra.mxu0 %v4844_v51 }
  0xfe   :  { %4031 = vmatpush3.msra.mxu1 %v6432_v38  ;;  %4005 = vmatprep.subr.mxu0 %v6300_v7 }
  0xff   :  { %4032 = vmatprep.subr.mxu1 %v6351_v58  ;;  %4006 = vmatpush3.msra.mxu0 %v6302_v55 }
 0x100   :  { %4033 = vmatpush3.msra.mxu1 %v6352_v47  ;;  %4007 = vmatprep.subr.mxu0 %v4911_v13 }
 0x101   :  { %4034 = vmatprep.subr.mxu1 %v6353_v6  ;;  %4008 = vmatpush3.msra.mxu0 %v4937_v30 }
 0x102   :  { %4035 = vmatpush3.msra.mxu1 %v6354_v28  ;;  %1898 = vmatprep.mubr.f32.mxu0 %v1897_v62  ;;  %v6434_v62 = vld [vmem:[#allocation36_spill] sm:$0xff] }
 0x103   :  { %4036 = vmatprep.subr.mxu1 %v6355_v20  ;;  %4047 = vmatprep.subr.mxu0 %v6356_v57 }
 0x104   :  { %1904 = vmatmul.mubr.f32.vlgmr.msra.gmra.mxu0 %v1903_v19  ;;  %4037 = vmatpush3.msra.mxu1 %v5060_v27  ;;  %v6436_v19 = vld [vmem:[#allocation42_spill] sm:$0xff] }
 0x105   :  { %4048 = vmatpush3.msra.mxu0 %v4500_v23  ;;  %4038 = vmatprep.subr.mxu1 %v5068_v41 }
 0x106   :  { %4049 = vmatprep.subr.mxu0 %v4506_v25  ;;  %4039 = vmatpush3.msra.mxu1 %v5078_v39  ;;  %v6485_v39 = vld [vmem:[#allocation100_spill] sm:$0xff] }
 0x107   :  { %4050 = vmatpush3.msra.mxu0 %v4531_v31  ;;  %4040 = vmatprep.subr.mxu1 %v5085_v2  ;;  %v6482_v2 = vld [vmem:[#allocation89_spill] sm:$0xff] }
 0x108   :  { %4051 = vmatprep.subr.mxu0 %v4544_v35  ;;  %4041 = vmatpush3.msra.mxu1 %v5087_v33  ;;  %v6481_v35 = vld [vmem:[#allocation86_spill] sm:$0xff] }
 0x109   :  { %4052 = vmatpush3.msra.mxu0 %v4561_v40  ;;  %4042 = vmatprep.subr.mxu1 %v5097_v26  ;;  %v6478_v40 = vld [vmem:[#allocation73_spill] sm:$0xff] }
 0x10a   :  { %4053 = vmatprep.subr.mxu0 %v4575_v45  ;;  %4043 = vmatpush3.msra.mxu1 %v5101_v12  ;;  %v6467_v12 = vld [vmem:[#allocation35_spill] sm:$0xff] }
 0x10b   :  { %2134 = vmatprep.mubr.f32.mxu1 %v5496_v63  ;;  %4054 = vmatpush3.msra.mxu0 %v4620_v59  ;;  %v6462_v59 = vld [vmem:[#allocation19_spill] sm:$0xff] }
 0x10c   :  { %2136 = vmatmul.mubr.f32.vlgmr.msra.gmra.mxu1 %v5501_v37  ;;  %4055 = vmatprep.subr.mxu0 %v4637_v0  ;;  %v6438_v0 = vld [vmem:[#allocation52_spill] sm:$0xff]  ;;  %v6476_v45 = vld [vmem:[#allocation67_spill] sm:$0xff] }
 0x10d   :  { %4082 = vmatprep.subr.mxu1 %v4440_v3  ;;  %4056 = vmatpush3.msra.mxu0 %v6433_v54  ;;  %v6439_v54 = vld [vmem:[#allocation55_spill] sm:$0xff] }
 0x10e   :  { %4083 = vmatpush3.msra.mxu1 %v4442_v4  ;;  %4057 = vmatprep.subr.mxu0 %v6434_v62  ;;  %v6440_v62 = vld [vmem:[#allocation61_spill] sm:$0xff] }
 0x10f   :  { %4084 = vmatprep.subr.mxu1 %v4444_v5  ;;  %4058 = vmatpush3.msra.mxu0 %v6435_v21  ;;  %v6441_v21 = vld [vmem:[#allocation63_spill] sm:$0xff] }
 0x110   :  { %4085 = vmatpush3.msra.mxu1 %v4455_v9  ;;  %4059 = vmatprep.subr.mxu0 %v6436_v19  ;;  %v6442_v19 = vld [vmem:[#allocation65_spill] sm:$0xff] }
 0x111   :  { %4086 = vmatprep.subr.mxu1 %v4457_v10  ;;  %4060 = vmatpush3.msra.mxu0 %v6437_v42  ;;  %v6443_v42 = vld [vmem:[#allocation68_spill] sm:$0xff] }
 0x112   :  { %4087 = vmatpush3.msra.mxu1 %v4459_v11  ;;  %4061 = vmatprep.subr.mxu0 %v6438_v0  ;;  %v6444_v0 = vld [vmem:[#allocation72_spill] sm:$0xff] }
 0x113   :  { %4088 = vmatprep.subr.mxu1 %v4471_v15  ;;  %4062 = vmatpush3.msra.mxu0 %v6439_v54  ;;  %v6445_v54 = vld [vmem:[#allocation75_spill] sm:$0xff] }
 0x114   :  { %4089 = vmatpush3.msra.mxu1 %v4473_v16  ;;  %4063 = vmatprep.subr.mxu0 %v6440_v62  ;;  %v6446_v62 = vld [vmem:[#allocation81_spill] sm:$0xff] }
 0x115   :  { %4090 = vmatprep.subr.mxu1 %v4475_v17  ;;  %4064 = vmatpush3.msra.mxu0 %v6441_v21  ;;  %v6447_v21 = vld [vmem:[#allocation83_spill] sm:$0xff] }
 0x116   :  { %4091 = vmatpush3.msra.mxu1 %v4497_v22  ;;  %4065 = vmatprep.subr.mxu0 %v6442_v19  ;;  %v6448_v19 = vld [vmem:[#allocation90_spill] sm:$0xff] }
 0x117   :  { %4092 = vmatprep.subr.mxu1 %v4503_v24  ;;  %4066 = vmatpush3.msra.mxu0 %v6443_v42  ;;  %v6449_v42 = vld [vmem:[#allocation94_spill] sm:$0xff] }
 0x118   :  { %4093 = vmatpush3.msra.mxu1 %v6282_v18  ;;  %4067 = vmatprep.subr.mxu0 %v6444_v0  ;;  %v6450_v0 = vld [vmem:[#allocation96_spill] sm:$0xff] }
 0x119   :  { %4094 = vmatprep.subr.mxu1 %v6283_v60  ;;  %4068 = vmatpush3.msra.mxu0 %v6445_v54  ;;  %v6451_v54 = vld [vmem:[#allocation98_spill] sm:$0xff] }
 0x11a   :  { %4095 = vmatpush3.msra.mxu1 %v6284_v44  ;;  %4069 = vmatprep.subr.mxu0 %v6446_v62  ;;  %v6452_v62 = vld [vmem:[#allocation101_spill] sm:$0xff] }
 0x11b   :  { %4096 = vmatprep.subr.mxu1 %v6285_v46  ;;  %4070 = vmatpush3.msra.mxu0 %v6447_v21  ;;  %v6453_v21 = vld [vmem:[#allocation102_spill] sm:$0xff] }
 0x11c   :  { %4097 = vmatpush3.msra.mxu1 %v6286_v48  ;;  %4071 = vmatprep.subr.mxu0 %v6448_v19  ;;  %v6454_v19 = vld [vmem:[#allocation106_spill] sm:$0xff] }
 0x11d   :  { %4098 = vmatprep.subr.mxu1 %v6287_v56  ;;  %4072 = vmatpush3.msra.mxu0 %v6449_v42  ;;  %v6455_v42 = vld [vmem:[#allocation107_spill] sm:$0xff] }
 0x11e   :  { %4099 = vmatpush3.msra.mxu1 %v6288_v61  ;;  %4073 = vmatprep.subr.mxu0 %v6450_v0  ;;  %v6456_v0 = vld [vmem:[#allocation54_spill] sm:$0xff] }
 0x11f   :  { %4100 = vmatprep.subr.mxu1 %v6289_v14  ;;  %4074 = vmatpush3.msra.mxu0 %v6451_v54  ;;  %v6461_v54 = vld [vmem:[#allocation16_spill] sm:$0xff] }
 0x120   :  { %4101 = vmatpush3.msra.mxu1 %v6290_v50  ;;  %4075 = vmatprep.subr.mxu0 %v6452_v62  ;;  %v6457_v62 = vld [vmem:[#allocation5_spill] sm:$0xff] }
 0x121   :  { %4102 = vmatprep.subr.mxu1 %v6291_v43  ;;  %4076 = vmatpush3.msra.mxu0 %v6453_v21  ;;  %v6458_v21 = vld [vmem:[#allocation9_spill] sm:$0xff] }
 0x122   :  { %4103 = vmatpush3.msra.mxu1 %v6292_v36  ;;  %4077 = vmatprep.subr.mxu0 %v6454_v19  ;;  %v6459_v19 = vld [vmem:[#allocation10_spill] sm:$0xff] }
 0x123   :  { %4104 = vmatprep.subr.mxu1 %v6293_v52  ;;  %4078 = vmatpush3.msra.mxu0 %v6455_v42  ;;  %v6460_v42 = vld [vmem:[#allocation13_spill] sm:$0xff] }
 0x124   :  { %2271 = vmatprep.mubr.f32.mxu0 %v5511_v49  ;;  %4105 = vmatpush3.msra.mxu1 %v6456_v0 }
 0x125   :  { %2274 = vmatmul.mubr.f32.vlgmr.msra.gmra.mxu0 %v5517_v8  ;;  %4106 = vmatprep.subr.mxu1 %v6295_v53 }
 0x126   :  { %4117 = vmatprep.subr.mxu0 %v6457_v62  ;;  %4107 = vmatpush3.msra.mxu1 %v4812_v34  ;;  %v6463_v62 = vld [vmem:[#allocation23_spill] sm:$0xff] }
 0x127   :  { %4118 = vmatpush3.msra.mxu0 %v6458_v21  ;;  %4108 = vmatprep.subr.mxu1 %v4830_v29  ;;  %v6465_v21 = vld [vmem:[#allocation31_spill] sm:$0xff] }
 0x128   :  { %4119 = vmatprep.subr.mxu0 %v6459_v19  ;;  %4109 = vmatpush3.msra.mxu1 %v4844_v51  ;;  %v6464_v19 = vand.u32 4294901760, %v5511_v49  ;;  %v6470_v49 = vld [vmem:[#allocation45_spill] sm:$0xff] }
 0x129   :  { %4120 = vmatpush3.msra.mxu0 %v6460_v42  ;;  %4110 = vmatprep.subr.mxu1 %v6300_v7  ;;  %v6466_v42 = vand.u32 4294901760, %v5517_v8 }
 0x12a   :  { %4121 = vmatprep.subr.mxu0 %v6461_v54  ;;  %4111 = vmatpush3.msra.mxu1 %v6302_v55  ;;  %v3589_v54 = vpop.f32.mrf.mxu0 }
 0x12b   :  { %4122 = vmatpush3.msra.mxu0 %v6462_v59  ;;  %4112 = vmatprep.subr.mxu1 %v4911_v13  ;;  %v6468_v59 = vld [vmem:[#allocation38_spill] sm:$0xff] }
 0x12c   :  { %4123 = vmatprep.subr.mxu0 %v6463_v62  ;;  %4113 = vmatpush3.msra.mxu1 %v4937_v30  ;;  %v6469_v62 = vld [vmem:[#allocation41_spill] sm:$0xff]  ;;  %v3590_v8 = vpop.f32.mrf.mxu0 }
 0x12d   :  { %2378 = vmatprep.mubr.f32.mxu1 %v6464_v19  ;;  %4124 = vmatpush3.msra.mxu0 %v6465_v21  ;;  %v6471_v19 = vld [vmem:[#allocation48_spill] sm:$0xff] }
 0x12e   :  { %2382 = vmatmul.mubr.f32.vlgmr.msra.gmra.mxu1 %v6466_v42  ;;  %4125 = vmatprep.subr.mxu0 %v6467_v12  ;;  %v3624_v42 = vpop.f32.mrf.mxu1  ;;  %v6472_v12 = vld [vmem:[#allocation51_spill] sm:$0xff]  ;;  %v6474_v21 = vld [vmem:[#allocation60_spill] sm:$0xff] }
 0x12f   :  { %4152 = vmatprep.subr.mxu1 %v4440_v3  ;;  %4126 = vmatpush3.msra.mxu0 %v6468_v59  ;;  %v6473_v59 = vld [vmem:[#allocation57_spill] sm:$0xff] }
 0x130   :  { %4153 = vmatpush3.msra.mxu1 %v4442_v4  ;;  %4127 = vmatprep.subr.mxu0 %v6469_v62  ;;  %v3659_v62 = vpop.f32.mrf.mxu0 }
 0x131   :  { %4154 = vmatprep.subr.mxu1 %v4444_v5  ;;  %4128 = vmatpush3.msra.mxu0 %v6470_v49  ;;  %v6475_v49 = vld [vmem:[#allocation64_spill] sm:$0xff] }
 0x132   :  { %4155 = vmatpush3.msra.mxu1 %v4455_v9  ;;  %4129 = vmatprep.subr.mxu0 %v6471_v19  ;;  %v3625_v19 = vpop.f32.mrf.mxu1 }
 0x133   :  { %4156 = vmatprep.subr.mxu1 %v4457_v10  ;;  %4130 = vmatpush3.msra.mxu0 %v6472_v12  ;;  %v6477_v12 = vld [vmem:[#allocation71_spill] sm:$0xff]  ;;  %v3626_v33 = vadd.f32 %v3625_v19, %v3624_v42 }
 0x134   :  { %4157 = vmatpush3.msra.mxu1 %v4459_v11  ;;  %4131 = vmatprep.subr.mxu0 %v6473_v59  ;;  %v3660_v59 = vpop.f32.mrf.mxu0  ;;  %v3694_v26 = vpop.f32.mrf.mxu1 }
 0x135   :  { %4158 = vmatprep.subr.mxu1 %v4471_v15  ;;  %4132 = vmatpush3.msra.mxu0 %v6474_v21  ;;  %v6479_v21 = vld [vmem:[#allocation77_spill] sm:$0xff]  ;;  %v3661_v31 = vadd.f32 %v3660_v59, %v3659_v62 }
 0x136   :  { %4159 = vmatpush3.msra.mxu1 %v4473_v16  ;;  %4133 = vmatprep.subr.mxu0 %v6475_v49  ;;  %v6480_v49 = vld [vmem:[#allocation80_spill] sm:$0xff] }
 0x137   :  { %4160 = vmatprep.subr.mxu1 %v4475_v17  ;;  %4134 = vmatpush3.msra.mxu0 %v6476_v45 }
 0x138   :  { %4161 = vmatpush3.msra.mxu1 %v4497_v22  ;;  %4135 = vmatprep.subr.mxu0 %v6477_v12  ;;  %v3695_v12 = vpop.f32.mrf.mxu1 }
 0x139   :  { %4162 = vmatprep.subr.mxu1 %v4503_v24  ;;  %4136 = vmatpush3.msra.mxu0 %v6478_v40  ;;  %v3591_v40 = vadd.f32 %v3590_v8, %v3589_v54  ;;  %v6487_v54 = vld [vmem:[#allocation104_spill] sm:$0xff]  ;;  %v6488_v8 = vld [vmem:[#allocation105_spill] sm:$0xff] }
 0x13a   :  { %4163 = vmatpush3.msra.mxu1 %v6282_v18  ;;  %4137 = vmatprep.subr.mxu0 %v6479_v21  ;;  %v6483_v21 = vld [vmem:[#allocation92_spill] sm:$0xff] }
 0x13b   :  { %4164 = vmatprep.subr.mxu1 %v6283_v60  ;;  %4138 = vmatpush3.msra.mxu0 %v6480_v49  ;;  %v3729_v45 = vpop.f32.mrf.mxu0  ;;  %v6484_v49 = vld [vmem:[#allocation97_spill] sm:$0xff]  ;;  %v402_v42 = vadd.f32 %v3626_v33, %v3591_v40 }
 0x13c   :  { %4165 = vmatpush3.msra.mxu1 %v6284_v44  ;;  %4139 = vmatprep.subr.mxu0 %v6481_v35  ;;  %v3696_v35 = vadd.f32 %v3695_v12, %v3694_v26  ;;  %v6489_v26 = vld [vmem:[#allocation108_spill] sm:$0xff]  ;;  %v6490_v12 = vld [vmem:[#allocation110_spill] sm:$0xff] }
 0x13d   :  { %4166 = vmatprep.subr.mxu1 %v6285_v46  ;;  %4140 = vmatpush3.msra.mxu0 %v6482_v2  ;;  %v3730_v19 = vpop.f32.mrf.mxu0  ;;  %v6486_v2 = vld [vmem:[#allocation103_spill] sm:$0xff]  ;;  %v540_v59 = vadd.f32 %v3661_v31, %v402_v42 }
 0x13e   :  { %4167 = vmatpush3.msra.mxu1 %v6286_v48  ;;  %4141 = vmatprep.subr.mxu0 %v6483_v21  ;;  %v3731_v62 = vadd.f32 %v3730_v19, %v3729_v45 }
 0x13f   :  { %4168 = vmatprep.subr.mxu1 %v6287_v56  ;;  %4142 = vmatpush3.msra.mxu0 %v6484_v49  ;;  %v648_v33 = vadd.f32 %v3696_v35, %v540_v59  ;;  %v60_v35 = vld [vmem:[#allocation2] sm:$0xff] }
 0x140   :  { %4169 = vmatpush3.msra.mxu1 %v6288_v61  ;;  %4143 = vmatprep.subr.mxu0 %v6485_v39 }
 0x141   :  { %4170 = vmatprep.subr.mxu1 %v6289_v14  ;;  %4144 = vmatpush3.msra.mxu0 %v6486_v2  ;;  %v816_v45 = vadd.f32 %v3731_v62, %v648_v33  ;;  %v6491_v62 = vld [vmem:[#allocation18_spill] sm:$0xff] }
 0x142   :  { %4171 = vmatpush3.msra.mxu1 %v6290_v50  ;;  %4145 = vmatprep.subr.mxu0 %v6487_v54 }
 0x143   :  { %4172 = vmatprep.subr.mxu1 %v6291_v43  ;;  %4146 = vmatpush3.msra.mxu0 %v6488_v8 }
 0x144   :  { %4173 = vmatpush3.msra.mxu1 %v6292_v36  ;;  %v3764_v40 = vpop.f32.mrf.mxu1  ;;  %4147 = vmatprep.subr.mxu0 %v6489_v26 }
 0x145   :  { %4174 = vmatprep.subr.mxu1 %v6293_v52  ;;  %4148 = vmatpush3.msra.mxu0 %v6490_v12 }
 0x146   :  { %2548 = vmatprep.mubr.f32.mxu0 %v5496_v63  ;;  %v3765_v31 = vpop.f32.mrf.mxu1  ;;  %4175 = vmatpush3.msra.mxu1 %v6456_v0 }
 0x147   :  { %2550 = vmatmul.mubr.f32.vlgmr.msra.gmra.mxu0 %v5501_v37  ;;  %v3766_v19 = vadd.f32 %v3765_v31, %v3764_v40  ;;  %4176 = vmatprep.subr.mxu1 %v6295_v53  ;;  %v6492_v40 = vld [vmem:[#allocation6_spill] sm:$0xff]  ;;  %v6493_v31 = vld [vmem:[#allocation21_spill] sm:$0xff] }
 0x148   :  { %4187 = vmatprep.subr.mxu0 %v4440_v3  ;;  %4177 = vmatpush3.msra.mxu1 %v4812_v34  ;;  %v2663_v33 = vmul.f32 %v6492_v40, %v6492_v40  ;;  %v6499_v40 = vld [vmem:[#allocation34_spill] sm:$0xff] }
 0x149   :  { %4188 = vmatpush3.msra.mxu0 %v4442_v4  ;;  %v920_v42 = vadd.f32 %v3766_v19, %v816_v45  ;;  %4178 = vmatprep.subr.mxu1 %v4830_v29  ;;  %v6494_v45 = vld [vmem:[#allocation8_spill] sm:$0xff] }
 0x14a   :  { %4189 = vmatprep.subr.mxu0 %v4444_v5  ;;  %4179 = vmatpush3.msra.mxu1 %v4844_v51  ;;  %v2662_v19 = vmul.f32 %v6494_v45, %v6494_v45  ;;  %v6501_v45 = vld [vmem:[#allocation47_spill] sm:$0xff] }
 0x14b   :  { %4190 = vmatpush3.msra.mxu0 %v4455_v9  ;;  %v923_v59 = vadd.f32 %v920_v42, %v60_v35  ;;  %4180 = vmatprep.subr.mxu1 %v6300_v7  ;;  %v6497_v35 = vld [vmem:[#allocation27_spill] sm:$0xff]  ;;  %v5726_v42 = vand.u32 4294901760, %v2663_v33 }
 0x14c   :  { %4191 = vmatprep.subr.mxu0 %v4457_v10  ;;  %4181 = vmatpush3.msra.mxu1 %v6302_v55 }
 0x14d   :  { %4192 = vmatpush3.msra.mxu0 %v4459_v11  ;;  %925 = vst.msk [vmem:[#allocation2] sm:$0xff] %vm23_vm0, %v923_v59  ;;  %4182 = vmatprep.subr.mxu1 %v4911_v13  ;;  %v6498_v59 = vld [vmem:[#allocation30_spill] sm:$0xff] }
 0x14e   :  { %4193 = vmatprep.subr.mxu0 %v4471_v15  ;;  %4183 = vmatpush3.msra.mxu1 %v4937_v30 }
 0x14f   :  { %2652 = vmatprep.mubr.f32.mxu1 %v5496_v63  ;;  %4194 = vmatpush3.msra.mxu0 %v4473_v16  ;;  %v6495_v63 = vld [vmem:[#allocation22_spill] sm:$0xff] }
 0x150   :  { %2654 = vmatmul.mubr.f32.vlgmr.msra.gmra.mxu1 %v5501_v37  ;;  %4195 = vmatprep.subr.mxu0 %v4475_v17  ;;  %v6496_v37 = vld [vmem:[#allocation24_spill] sm:$0xff] }
 0x151   :  { %4222 = vmatprep.subr.mxu1 %v6491_v62  ;;  %4196 = vmatpush3.msra.mxu0 %v4497_v22  ;;  %v5730_v62 = vand.u32 4294901760, %v2662_v19 }
 0x152   :  { %4223 = vmatpush3.msra.mxu1 %v6493_v31  ;;  %4197 = vmatprep.subr.mxu0 %v4503_v24  ;;  %v6500_v31 = vld [vmem:[#allocation44_spill] sm:$0xff] }
 0x153   :  { %4224 = vmatprep.subr.mxu1 %v6495_v63  ;;  %4198 = vmatpush3.msra.mxu0 %v6282_v18  ;;  %v5739_v63 = vsub.f32 %v2663_v33, %v5726_v42 }
 0x154   :  { %4225 = vmatpush3.msra.mxu1 %v6496_v37  ;;  %4199 = vmatprep.subr.mxu0 %v6283_v60  ;;  %v6502_v37 = vld [vmem:[#allocation50_spill] sm:$0xff] }
 0x155   :  { %4226 = vmatprep.subr.mxu1 %v6497_v35  ;;  %4200 = vmatpush3.msra.mxu0 %v6284_v44  ;;  %v5744_v35 = vsub.f32 %v2662_v19, %v5730_v62  ;;  %v2762_v33 = vand.u32 4294901760, %v5739_v63 }
 0x156   :  { %4227 = vmatpush3.msra.mxu1 %v6498_v59  ;;  %4201 = vmatprep.subr.mxu0 %v6285_v46  ;;  %v6503_v59 = vld [vmem:[#allocation53_spill] sm:$0xff] }
 0x157   :  { %4228 = vmatprep.subr.mxu1 %v6499_v40  ;;  %4202 = vmatpush3.msra.mxu0 %v6286_v48  ;;  %v6504_v40 = vld [vmem:[#allocation56_spill] sm:$0xff]  ;;  %v2768_v19 = vand.u32 4294901760, %v5744_v35 }
 0x158   :  { %4229 = vmatpush3.msra.mxu1 %v6500_v31  ;;  %4203 = vmatprep.subr.mxu0 %v6287_v56  ;;  %v6505_v31 = vld [vmem:[#allocation59_spill] sm:$0xff] }
 0x159   :  { %4230 = vmatprep.subr.mxu1 %v6501_v45  ;;  %4204 = vmatpush3.msra.mxu0 %v6288_v61  ;;  %v6506_v45 = vld [vmem:[#allocation62_spill] sm:$0xff] }
 0x15a   :  { %4231 = vmatpush3.msra.mxu1 %v6502_v37  ;;  %4205 = vmatprep.subr.mxu0 %v6289_v14  ;;  %v6507_v37 = vld [vmem:[#allocation66_spill] sm:$0xff] }
 0x15b   :  { %4232 = vmatprep.subr.mxu1 %v6503_v59  ;;  %4206 = vmatpush3.msra.mxu0 %v6290_v50  ;;  %v6508_v59 = vld [vmem:[#allocation70_spill] sm:$0xff] }
 0x15c   :  { %4233 = vmatpush3.msra.mxu1 %v6504_v40  ;;  %4207 = vmatprep.subr.mxu0 %v6291_v43  ;;  %v2763_v40 = vsub.f32 %v5739_v63, %v2762_v33 }
 0x15d   :  { %4234 = vmatprep.subr.mxu1 %v6505_v31  ;;  %4208 = vmatpush3.msra.mxu0 %v6292_v36  ;;  %v6509_v31 = vld [vmem:[#allocation79_spill] sm:$0xff] }
 0x15e   :  { %4235 = vmatpush3.msra.mxu1 %v6506_v45  ;;  %4209 = vmatprep.subr.mxu0 %v6293_v52  ;;  %v2769_v45 = vsub.f32 %v5744_v35, %v2768_v19 }
 0x15f   :  { %4236 = vmatprep.subr.mxu1 %v6507_v37  ;;  %4210 = vmatpush3.msra.mxu0 %v6456_v0 }
 0x160   :  { %4237 = vmatpush3.msra.mxu1 %v6508_v59  ;;  %4211 = vmatprep.subr.mxu0 %v6295_v53  ;;  %v2770_v37 = vand.u32 4294901760, %v2769_v45  ;;  %v6522_v59 = vld [vmem:[#allocation36_spill] sm:$0xff]  ;;  %v6525_v45 = vld [vmem:[#allocation46_spill] sm:$0xff] }
 0x161   :  { %4238 = vmatprep.subr.mxu1 %v6429_v1  ;;  %4212 = vmatpush3.msra.mxu0 %v4812_v34  ;;  %v2764_v1 = vand.u32 4294901760, %v2763_v40  ;;  %v6523_v40 = vld [vmem:[#allocation39_spill] sm:$0xff] }
 0x162   :  { %4239 = vmatpush3.msra.mxu1 %v6509_v31  ;;  %4213 = vmatprep.subr.mxu0 %v4830_v29  ;;  %v6524_v31 = vld [vmem:[#allocation42_spill] sm:$0xff] }
 0x163   :  { %4240 = vmatprep.subr.mxu1 %v6431_v32  ;;  %4214 = vmatpush3.msra.mxu0 %v4844_v51  ;;  %v6511_v32 = vld [vmem:[#allocation7_spill] sm:$0xff] }
 0x164   :  { %4241 = vmatpush3.msra.mxu1 %v6432_v38  ;;  %4215 = vmatprep.subr.mxu0 %v6300_v7  ;;  %v6521_v38 = vld [vmem:[#allocation32_spill] sm:$0xff] }
 0x165   :  { %4242 = vmatprep.subr.mxu1 %v6351_v58  ;;  %4216 = vmatpush3.msra.mxu0 %v6302_v55  ;;  %v6512_v58 = vld [vmem:[#allocation111_spill] sm:$0xff] }
 0x166   :  { %4243 = vmatpush3.msra.mxu1 %v6352_v47  ;;  %4217 = vmatprep.subr.mxu0 %v4911_v13  ;;  %v6510_v47 = vld [vmem:[#allocation109_spill] sm:$0xff] }
 0x167   :  { %4244 = vmatprep.subr.mxu1 %v6353_v6  ;;  %4218 = vmatpush3.msra.mxu0 %v4937_v30  ;;  %v6516_v6 = vld [vmem:[#allocation113_spill] sm:$0xff] }
 0x168   :  { %4245 = vmatpush3.msra.mxu1 %v6354_v28  ;;  %2765 = vmatprep.mubr.f32.mxu0 %v2764_v1  ;;  %v6513_v28 = vld [vmem:[#allocation11_spill] sm:$0xff]  ;;  %v6526_v1 = vld [vmem:[#allocation52_spill] sm:$0xff] }
 0x169   :  { %4246 = vmatprep.subr.mxu1 %v6355_v20  ;;  %4257 = vmatprep.subr.mxu0 %v6356_v57  ;;  %v6514_v20 = vld [vmem:[#allocation112_spill] sm:$0xff]  ;;  %v6515_v57 = vld [vmem:[#allocation14_spill] sm:$0xff] }
 0x16a   :  { %2771 = vmatmul.mubr.f32.vlgmr.msra.gmra.mxu0 %v2770_v37  ;;  %4247 = vmatpush3.msra.mxu1 %v5060_v27  ;;  %v6517_v27 = vld [vmem:[#allocation17_spill] sm:$0xff]  ;;  %v6527_v37 = vld [vmem:[#allocation55_spill] sm:$0xff] }
 0x16b   :  { %4258 = vmatpush3.msra.mxu0 %v4500_v23  ;;  %4248 = vmatprep.subr.mxu1 %v5068_v41  ;;  %v6518_v23 = vld [vmem:[#allocation114_spill] sm:$0xff]  ;;  %v6520_v41 = vld [vmem:[#allocation28_spill] sm:$0xff] }
 0x16c   :  { %4259 = vmatprep.subr.mxu0 %v4506_v25  ;;  %4249 = vmatpush3.msra.mxu1 %v6510_v47  ;;  %v6519_v25 = vld [vmem:[#allocation25_spill] sm:$0xff] }
 0x16d   :  { %4260 = vmatpush3.msra.mxu0 %v6511_v32  ;;  %4250 = vmatprep.subr.mxu1 %v6512_v58  ;;  %v6528_v47 = vld [vmem:[#allocation61_spill] sm:$0xff]  ;;  %v6529_v32 = vld [vmem:[#allocation63_spill] sm:$0xff] }
 0x16e   :  { %4261 = vmatprep.subr.mxu0 %v6513_v28  ;;  %4251 = vmatpush3.msra.mxu1 %v6514_v20  ;;  %v6530_v58 = vld [vmem:[#allocation65_spill] sm:$0xff]  ;;  %v6531_v28 = vld [vmem:[#allocation68_spill] sm:$0xff] }
 0x16f   :  { %4262 = vmatpush3.msra.mxu0 %v6515_v57  ;;  %4252 = vmatprep.subr.mxu1 %v6516_v6  ;;  %v6532_v20 = vld [vmem:[#allocation72_spill] sm:$0xff]  ;;  %v6533_v57 = vld [vmem:[#allocation75_spill] sm:$0xff]  ;;  %v6534_v6 = vld [vmem:[#allocation81_spill] sm:$0xff] }
 0x170   :  { %4263 = vmatprep.subr.mxu0 %v6517_v27  ;;  %4253 = vmatpush3.msra.mxu1 %v6518_v23  ;;  %v6535_v27 = vld [vmem:[#allocation83_spill] sm:$0xff]  ;;  %v6536_v23 = vld [vmem:[#allocation90_spill] sm:$0xff] }
 0x171   :  { %3001 = vmatprep.mubr.f32.mxu1 %v5726_v42  ;;  %4264 = vmatpush3.msra.mxu0 %v6519_v25  ;;  %v6537_v25 = vld [vmem:[#allocation94_spill] sm:$0xff] }
 0x172   :  { %3003 = vmatmul.mubr.f32.vlgmr.msra.gmra.mxu1 %v5730_v62  ;;  %4265 = vmatprep.subr.mxu0 %v6520_v41  ;;  %v6538_v41 = vld [vmem:[#allocation96_spill] sm:$0xff] }
 0x173   :  { %4292 = vmatprep.subr.mxu1 %v4440_v3  ;;  %4266 = vmatpush3.msra.mxu0 %v6521_v38  ;;  %v6539_v38 = vld [vmem:[#allocation98_spill] sm:$0xff] }
 0x174   :  { %4293 = vmatpush3.msra.mxu1 %v4442_v4  ;;  %4267 = vmatprep.subr.mxu0 %v6522_v59  ;;  %v6540_v59 = vld [vmem:[#allocation101_spill] sm:$0xff] }
 0x175   :  { %4294 = vmatprep.subr.mxu1 %v4444_v5  ;;  %4268 = vmatpush3.msra.mxu0 %v6523_v40  ;;  %v6541_v40 = vld [vmem:[#allocation102_spill] sm:$0xff] }
 0x176   :  { %4295 = vmatpush3.msra.mxu1 %v4455_v9  ;;  %4269 = vmatprep.subr.mxu0 %v6524_v31  ;;  %v6542_v31 = vld [vmem:[#allocation106_spill] sm:$0xff] }
 0x177   :  { %4296 = vmatprep.subr.mxu1 %v4457_v10  ;;  %4270 = vmatpush3.msra.mxu0 %v6525_v45  ;;  %v6543_v45 = vld [vmem:[#allocation107_spill] sm:$0xff] }
 0x178   :  { %4297 = vmatpush3.msra.mxu1 %v4459_v11  ;;  %4271 = vmatprep.subr.mxu0 %v6526_v1  ;;  %v6544_v1 = vld [vmem:[#allocation5_spill] sm:$0xff] }
 0x179   :  { %4298 = vmatprep.subr.mxu1 %v4471_v15  ;;  %4272 = vmatpush3.msra.mxu0 %v6527_v37  ;;  %v6545_v37 = vld [vmem:[#allocation9_spill] sm:$0xff] }
 0x17a   :  { %4299 = vmatpush3.msra.mxu1 %v4473_v16  ;;  %4273 = vmatprep.subr.mxu0 %v6528_v47  ;;  %v6546_v47 = vld [vmem:[#allocation10_spill] sm:$0xff] }
 0x17b   :  { %4300 = vmatprep.subr.mxu1 %v4475_v17  ;;  %4274 = vmatpush3.msra.mxu0 %v6529_v32  ;;  %v6547_v32 = vld [vmem:[#allocation13_spill] sm:$0xff] }
 0x17c   :  { %4301 = vmatpush3.msra.mxu1 %v4497_v22  ;;  %4275 = vmatprep.subr.mxu0 %v6530_v58  ;;  %v6548_v58 = vld [vmem:[#allocation16_spill] sm:$0xff] }
 0x17d   :  { %4302 = vmatprep.subr.mxu1 %v4503_v24  ;;  %4276 = vmatpush3.msra.mxu0 %v6531_v28  ;;  %v6549_v28 = vld [vmem:[#allocation19_spill] sm:$0xff] }
 0x17e   :  { %4303 = vmatpush3.msra.mxu1 %v6282_v18  ;;  %4277 = vmatprep.subr.mxu0 %v6532_v20  ;;  %v6550_v20 = vld [vmem:[#allocation23_spill] sm:$0xff] }
 0x17f   :  { %4304 = vmatprep.subr.mxu1 %v6283_v60  ;;  %4278 = vmatpush3.msra.mxu0 %v6533_v57  ;;  %v6551_v57 = vld [vmem:[#allocation31_spill] sm:$0xff] }
 0x180   :  { %4305 = vmatpush3.msra.mxu1 %v6284_v44  ;;  %4279 = vmatprep.subr.mxu0 %v6534_v6  ;;  %v6552_v6 = vld [vmem:[#allocation35_spill] sm:$0xff] }
 0x181   :  { %4306 = vmatprep.subr.mxu1 %v6285_v46  ;;  %4280 = vmatpush3.msra.mxu0 %v6535_v27  ;;  %v3799_v27 = vpop.f32.mrf.mxu0 }
 0x182   :  { %4307 = vmatpush3.msra.mxu1 %v6286_v48  ;;  %4281 = vmatprep.subr.mxu0 %v6536_v23  ;;  %v6553_v23 = vld [vmem:[#allocation38_spill] sm:$0xff] }
 0x183   :  { %4308 = vmatprep.subr.mxu1 %v6287_v56  ;;  %4282 = vmatpush3.msra.mxu0 %v6537_v25  ;;  %v6554_v25 = vld [vmem:[#allocation41_spill] sm:$0xff] }
 0x184   :  { %4309 = vmatpush3.msra.mxu1 %v6288_v61  ;;  %4283 = vmatprep.subr.mxu0 %v6538_v41  ;;  %v6558_v41 = vld [vmem:[#allocation57_spill] sm:$0xff] }
 0x185   :  { %4310 = vmatprep.subr.mxu1 %v6289_v14  ;;  %4284 = vmatpush3.msra.mxu0 %v6539_v38  ;;  %v6561_v38 = vld [vmem:[#allocation67_spill] sm:$0xff] }
 0x186   :  { %4311 = vmatpush3.msra.mxu1 %v6290_v50  ;;  %4285 = vmatprep.subr.mxu0 %v6540_v59  ;;  %v6562_v59 = vld [vmem:[#allocation71_spill] sm:$0xff] }
 0x187   :  { %4312 = vmatprep.subr.mxu1 %v6291_v43  ;;  %4286 = vmatpush3.msra.mxu0 %v6541_v40  ;;  %v6563_v40 = vld [vmem:[#allocation73_spill] sm:$0xff] }
 0x188   :  { %4313 = vmatpush3.msra.mxu1 %v6292_v36  ;;  %4287 = vmatprep.subr.mxu0 %v6542_v31 }
 0x189   :  { %4314 = vmatprep.subr.mxu1 %v6293_v52  ;;  %4288 = vmatpush3.msra.mxu0 %v6543_v45  ;;  %v6566_v45 = vld [vmem:[#allocation86_spill] sm:$0xff] }
 0x18a   :  { %3138 = vmatprep.mubr.f32.mxu0 %v5739_v63  ;;  %4315 = vmatpush3.msra.mxu1 %v6456_v0  ;;  %v6555_v63 = vld [vmem:[#allocation45_spill] sm:$0xff] }
 0x18b   :  { %3141 = vmatmul.mubr.f32.vlgmr.msra.gmra.mxu0 %v5744_v35  ;;  %4316 = vmatprep.subr.mxu1 %v6295_v53  ;;  %v3800_v35 = vpop.f32.mrf.mxu0 }
 0x18c   :  { %4327 = vmatprep.subr.mxu0 %v6544_v1  ;;  %4317 = vmatpush3.msra.mxu1 %v4812_v34  ;;  %v6567_v1 = vld [vmem:[#allocation89_spill] sm:$0xff] }
 0x18d   :  { %4328 = vmatpush3.msra.mxu0 %v6545_v37  ;;  %4318 = vmatprep.subr.mxu1 %v4830_v29 }
 0x18e   :  { %4329 = vmatprep.subr.mxu0 %v6546_v47  ;;  %4319 = vmatpush3.msra.mxu1 %v4844_v51 }
 0x18f   :  { %4330 = vmatpush3.msra.mxu0 %v6547_v32  ;;  %4320 = vmatprep.subr.mxu1 %v6300_v7 }
 0x190   :  { %4331 = vmatprep.subr.mxu0 %v6548_v58  ;;  %4321 = vmatpush3.msra.mxu1 %v6302_v55 }
 0x191   :  { %4332 = vmatpush3.msra.mxu0 %v6549_v28  ;;  %4322 = vmatprep.subr.mxu1 %v4911_v13 }
 0x192   :  { %4333 = vmatprep.subr.mxu0 %v6550_v20  ;;  %4323 = vmatpush3.msra.mxu1 %v4937_v30 }
 0x193   :  { %3245 = vmatprep.mubr.f32.mxu1 %v2762_v33  ;;  %4334 = vmatpush3.msra.mxu0 %v6551_v57  ;;  %v6556_v33 = vld [vmem:[#allocation48_spill] sm:$0xff] }
 0x194   :  { %3249 = vmatmul.mubr.f32.vlgmr.msra.gmra.mxu1 %v2768_v19  ;;  %4335 = vmatprep.subr.mxu0 %v6552_v6  ;;  %v3834_v19 = vpop.f32.mrf.mxu1  ;;  %v1796_v6 = vld [vmem:[#allocation2] sm:$0xff] }
 0x195   :  { %4362 = vmatprep.subr.mxu1 %v4440_v3  ;;  %4336 = vmatpush3.msra.mxu0 %v6553_v23  ;;  %v6557_v3 = vld [vmem:[#allocation51_spill] sm:$0xff] }
 0x196   :  { %4363 = vmatpush3.msra.mxu1 %v4442_v4  ;;  %4337 = vmatprep.subr.mxu0 %v6554_v25  ;;  %v3869_v4 = vpop.f32.mrf.mxu0 }
 0x197   :  { %4364 = vmatprep.subr.mxu1 %v4444_v5  ;;  %4338 = vmatpush3.msra.mxu0 %v6555_v63  ;;  %v6559_v5 = vld [vmem:[#allocation60_spill] sm:$0xff] }
 0x198   :  { %4365 = vmatpush3.msra.mxu1 %v4455_v9  ;;  %4339 = vmatprep.subr.mxu0 %v6556_v33  ;;  %v6560_v9 = vld [vmem:[#allocation64_spill] sm:$0xff] }
 0x199   :  { %4366 = vmatprep.subr.mxu1 %v4457_v10  ;;  %4340 = vmatpush3.msra.mxu0 %v6557_v3  ;;  %v3835_v10 = vpop.f32.mrf.mxu1 }
 0x19a   :  { %4367 = vmatpush3.msra.mxu1 %v4459_v11  ;;  %4341 = vmatprep.subr.mxu0 %v6558_v41  ;;  %v3870_v11 = vpop.f32.mrf.mxu0 }
 0x19b   :  { %4368 = vmatprep.subr.mxu1 %v4471_v15  ;;  %4342 = vmatpush3.msra.mxu0 %v6559_v5  ;;  %v3904_v15 = vpop.f32.mrf.mxu1  ;;  %v3871_v37 = vadd.f32 %v3870_v11, %v3869_v4 }
 0x19c   :  { %4369 = vmatpush3.msra.mxu1 %v4473_v16  ;;  %4343 = vmatprep.subr.mxu0 %v6560_v9  ;;  %v6564_v16 = vld [vmem:[#allocation77_spill] sm:$0xff] }
 0x19d   :  { %4370 = vmatprep.subr.mxu1 %v4475_v17  ;;  %4344 = vmatpush3.msra.mxu0 %v6561_v38  ;;  %v6565_v17 = vld [vmem:[#allocation80_spill] sm:$0xff] }
 0x19e   :  { %4371 = vmatpush3.msra.mxu1 %v4497_v22  ;;  %4345 = vmatprep.subr.mxu0 %v6562_v59  ;;  %v3836_v22 = vadd.f32 %v3835_v10, %v3834_v19 }
 0x19f   :  { %4372 = vmatprep.subr.mxu1 %v4503_v24  ;;  %4346 = vmatpush3.msra.mxu0 %v6563_v40  ;;  %v3905_v24 = vpop.f32.mrf.mxu1 }
 0x1a0   :  { %4373 = vmatpush3.msra.mxu1 %v6282_v18  ;;  %4347 = vmatprep.subr.mxu0 %v6564_v16  ;;  %v3801_v18 = vadd.f32 %v3800_v35, %v3799_v27  ;;  %v3906_v47 = vadd.f32 %v3905_v24, %v3904_v15 }
 0x1a1   :  { %4374 = vmatprep.subr.mxu1 %v6283_v60  ;;  %4348 = vmatpush3.msra.mxu0 %v6565_v17  ;;  %v3939_v31 = vpop.f32.mrf.mxu0 }
 0x1a2   :  { %4375 = vmatpush3.msra.mxu1 %v6284_v44  ;;  %4349 = vmatprep.subr.mxu0 %v6566_v45  ;;  %v1270_v44 = vadd.f32 %v3836_v22, %v3801_v18 }
 0x1a3   :  { %4376 = vmatprep.subr.mxu1 %v6285_v46  ;;  %4350 = vmatpush3.msra.mxu0 %v6567_v1  ;;  %v3940_v60 = vpop.f32.mrf.mxu0 }
 0x1a4   :  { %4377 = vmatpush3.msra.mxu1 %v6286_v48  ;;  %4351 = vmatprep.subr.mxu0 %v6483_v21  ;;  %v1408_v48 = vadd.f32 %v3871_v37, %v1270_v44  ;;  %v3941_v46 = vadd.f32 %v3940_v60, %v3939_v31 }
 0x1a5   :  { %4378 = vmatprep.subr.mxu1 %v6287_v56  ;;  %4352 = vmatpush3.msra.mxu0 %v6484_v49 }
 0x1a6   :  { %4379 = vmatpush3.msra.mxu1 %v6288_v61  ;;  %4353 = vmatprep.subr.mxu0 %v6485_v39  ;;  %v1516_v61 = vadd.f32 %v3906_v47, %v1408_v48 }
 0x1a7   :  { %4380 = vmatprep.subr.mxu1 %v6289_v14  ;;  %4354 = vmatpush3.msra.mxu0 %v6486_v2 }
 0x1a8   :  { %4381 = vmatpush3.msra.mxu1 %v6290_v50  ;;  %4355 = vmatprep.subr.mxu0 %v6487_v54  ;;  %v1684_v14 = vadd.f32 %v3941_v46, %v1516_v61 }
 0x1a9   :  { %4382 = vmatprep.subr.mxu1 %v6291_v43  ;;  %4356 = vmatpush3.msra.mxu0 %v6488_v8 }
 0x1aa   :  { %4383 = vmatpush3.msra.mxu1 %v6292_v36  ;;  %v3974_v56 = vpop.f32.mrf.mxu1  ;;  %4357 = vmatprep.subr.mxu0 %v6489_v26  ;;  %v926_v36 = vld [vmem:[#allocation3] sm:$0xff] }
 0x1ab   :  { %4384 = vmatprep.subr.mxu1 %v6293_v52  ;;  %4358 = vmatpush3.msra.mxu0 %v6490_v12 }
 0x1ac   :  { %3415 = vmatprep.mubr.f32.mxu0 %v5726_v42  ;;  %v3975_v50 = vpop.f32.mrf.mxu1  ;;  %4385 = vmatpush3.msra.mxu1 %v6456_v0 }
 0x1ad   :  { %3417 = vmatmul.mubr.f32.vlgmr.msra.gmra.mxu0 %v5730_v62  ;;  %v3976_v43 = vadd.f32 %v3975_v50, %v3974_v56  ;;  %4386 = vmatprep.subr.mxu1 %v6295_v53  ;;  %v3540_v50 = vld [vmem:[%s5949_s2] sm:$0xff] }
 0x1ae   :  { %3519 = vmatprep.mubr.f32.mxu1 %v5726_v42  ;;  %4387 = vmatpush3.msra.mxu1 %v4812_v34 }
 0x1af   :  { %v1788_v39 = vadd.f32 %v3976_v43, %v1684_v14  ;;  %4388 = vmatprep.subr.mxu1 %v4830_v29 }
 0x1b0   :  { %4389 = vmatpush3.msra.mxu1 %v4844_v51 }
 0x1b1   :  { %v1791_v52 = vadd.f32 %v1788_v39, %v926_v36  ;;  %4390 = vmatprep.subr.mxu1 %v6300_v7  ;;  %v3543_v36 = vld [vmem:[%s5950_s3] sm:$0xff] }
 0x1b2   :  { %4391 = vmatpush3.msra.mxu1 %v6302_v55 }
 0x1b3   :  { %1792 = vst.msk [vmem:[#allocation3] sm:$0xff] %vm23_vm0, %v1791_v52  ;;  %4392 = vmatprep.subr.mxu1 %v4911_v13 }
 0x1b4   :  { %4393 = vmatpush3.msra.mxu1 %v4937_v30 }
 0x1b5   :  { %3521 = vmatmul.mubr.f32.vlgmr.msra.gmra.mxu1 %v5730_v62 }
 0x1ba   :  { %v2661_v1 = vld [vmem:[#allocation3] sm:$0xff] }
 0x1c4   :  { %v4009_v0 = vpop.f32.mrf.mxu0 }
 0x1c6   :  { %v4010_v34 = vpop.f32.mrf.mxu0 }
 0x1c7   :  { %v4011_v8 = vadd.f32 %v4010_v34, %v4009_v0 }
 0x1cc   :  { %v4044_v53 = vpop.f32.mrf.mxu1 }
 0x1ce   :  { %v4045_v29 = vpop.f32.mrf.mxu1 }
 0x1cf   :  { %v4046_v54 = vadd.f32 %v4045_v29, %v4044_v53 }
 0x1d1   :  { %v2138_v12 = vadd.f32 %v4046_v54, %v4011_v8 }
 0x1e5   :  { %v4079_v2 = vpop.f32.mrf.mxu0 }
 0x1e7   :  { %v4080_v21 = vpop.f32.mrf.mxu0 }
 0x1e8   :  { %v4081_v55 = vadd.f32 %v4080_v21, %v4079_v2 }
 0x1ea   :  { %v2276_v13 = vadd.f32 %v4081_v55, %v2138_v12 }
 0x1ee   :  { %v4114_v51 = vpop.f32.mrf.mxu1 }
 0x1f0   :  { %v4115_v7 = vpop.f32.mrf.mxu1 }
 0x1f1   :  { %v4116_v42 = vadd.f32 %v4115_v7, %v4114_v51 }
 0x1f3   :  { %v2384_v58 = vadd.f32 %v4116_v42, %v2276_v13 }
 0x207   :  { %v4149_v49 = vpop.f32.mrf.mxu0 }
 0x209   :  { %v4150_v26 = vpop.f32.mrf.mxu0 }
 0x20a   :  { %v4151_v32 = vadd.f32 %v4150_v26, %v4149_v49 }
 0x20c   :  { %v2552_v28 = vadd.f32 %v4151_v32, %v2384_v58 }
 0x210   :  { %v4184_v30 = vpop.f32.mrf.mxu1 }
 0x212   :  { %v4185_v62 = vpop.f32.mrf.mxu1 }
 0x213   :  { %v4186_v20 = vadd.f32 %v4185_v62, %v4184_v30 }
 0x215   :  { %v2656_v57 = vadd.f32 %v4186_v20, %v2552_v28 }
 0x217   :  { %v2659_v27 = vadd.f32 %v2656_v57, %v1796_v6 }
 0x219   :  { %2660 = vst.msk [vmem:[#allocation2] sm:$0xff] %vm23_vm0, %v2659_v27 }
 0x220   :  { %v3531_v37 = vld [vmem:[#allocation2] sm:$0xff] }
 0x221   :  { %v3532_v60 = vmul.f32 0.001953125, %v3531_v37 }
 0x223   :  { %v3535_v47 = vmul.f32 %v3532_v60, %v3532_v60 }
 0x22a   :  { %v4219_v23 = vpop.f32.mrf.mxu0 }
 0x22c   :  { %v4220_v25 = vpop.f32.mrf.mxu0 }
 0x22d   :  { %v4221_v9 = vadd.f32 %v4220_v25, %v4219_v23 }
 0x232   :  { %v4254_v63 = vpop.f32.mrf.mxu1 }
 0x234   :  { %v4255_v35 = vpop.f32.mrf.mxu1 }
 0x235   :  { %v4256_v4 = vadd.f32 %v4255_v35, %v4254_v63 }
 0x237   :  { %v3005_v59 = vadd.f32 %v4256_v4, %v4221_v9 }
 0x24b   :  { %v4289_v33 = vpop.f32.mrf.mxu0 }
 0x24d   :  { %v4290_v19 = vpop.f32.mrf.mxu0 }
 0x24e   :  { %v4291_v10 = vadd.f32 %v4290_v19, %v4289_v33 }
 0x250   :  { %v3143_v15 = vadd.f32 %v4291_v10, %v3005_v59 }
 0x254   :  { %v4324_v3 = vpop.f32.mrf.mxu1 }
 0x256   :  { %v4325_v5 = vpop.f32.mrf.mxu1 }
 0x257   :  { %v4326_v11 = vadd.f32 %v4325_v5, %v4324_v3 }
 0x259   :  { %v3251_v17 = vadd.f32 %v4326_v11, %v3143_v15 }
 0x26d   :  { %v4359_v41 = vpop.f32.mrf.mxu0 }
 0x26f   :  { %v4360_v38 = vpop.f32.mrf.mxu0 }
 0x270   :  { %v4361_v40 = vadd.f32 %v4360_v38, %v4359_v41 }
 0x272   :  { %v3419_v22 = vadd.f32 %v4361_v40, %v3251_v17 }
 0x275   :  { %v4394_v16 = vpop.f32.mrf.mxu1 }
 0x277   :  { %v4395_v31 = vpop.f32.mrf.mxu1 }
 0x278   :  { %v4396_v45 = vadd.f32 %v4395_v31, %v4394_v16 }
 0x27a   :  { %v3523_v24 = vadd.f32 %v4396_v45, %v3419_v22 }
 0x27c   :  { %v3526_v18 = vadd.f32 %v3523_v24, %v2661_v1 }
 0x27e   :  { %3527 = vst.msk [vmem:[#allocation3] sm:$0xff] %vm23_vm0, %v3526_v18 }
 0x285   :  { %v3533_v44 = vld [vmem:[#allocation3] sm:$0xff] }
 0x286   :  { %v3534_v48 = vmul.f32 0.001953125, %v3533_v44 }
 0x288   :  { %v3536_v46 = vsub.f32 %v3534_v48, %v3535_v47 }
 0x28a   :  { %v3537_v56 = vmax.f32 %v3536_v46, 0.0 }
 0x28c   :  { %v3538_v61 = vadd.f32 1e-05, %v3537_v56 }
 0x28e   :  { %4398 = vrsqrt.f32 %v3538_v61 }
 0x29b   :  { %v4399_v14 = vpop.eup %4398 }
 0x29c   :  { %v3541_v43 = vmul.f32 %v4399_v14, %v3540_v50 }
 0x29e   :  { %3542 = vst.msk [vmem:[%s5951_s4] sm:$0xff] %vm23_vm0, %v3541_v43  ;;  %v3544_v39 = vmul.f32 %v3541_v43, %v3532_v60 }
 0x2a0   :  { %v3545_v52 = vsub.f32 %v3543_v36, %v3544_v39 }
 0x2a2   :  { %3546 = vst.msk [vmem:[%s5952_s5] sm:$0xff] %vm23_vm0, %v3545_v52 }

</bundles_post_ra>
